<compile_context>
chip_gen: v7x
topology: tpu7x:2x2x1
jax: 0.10.0
libtpu: 0.0.40
codegen_flags: <defaults>
</compile_context>

<pallas_src>
import functools
import math

import jax
import jax.numpy as jnp
from jax.experimental import pallas as pl
from jax.experimental.pallas import tpu as pltpu


_VMEM_LIMIT = 48 * 1024 * 1024  # comfortably below v7x's 64 MiB physical VMEM


def _rup(x, m):
    return ((x + m - 1) // m) * m


def _choose_tile(dim, max_tile, grain):
    """Pick a tile for `dim`: full dim if small, else the largest multiple of
    `grain` <= max_tile dividing dim, else pad.  Returns (tile, padded_dim)."""
    if dim <= max_tile:
        return dim, dim
    t = max_tile - (max_tile % grain)
    while t >= grain:
        if dim % t == 0:
            return t, dim
        t -= grain
    t = max_tile - (max_tile % grain)
    return t, _rup(dim, t)


# ----------------------------------------------------------------------------
# Pallas kernels
# ----------------------------------------------------------------------------
def _mm_kernel(a_ref, b_ref, s_ref, bias_ref, o_ref, acc_ref, *, relu):
    """o = act((a @ b) * scale + bias); K-reduction over grid axis 2."""
    @pl.when(pl.program_id(2) == 0)
    def _init():
        acc_ref[...] = jnp.zeros_like(acc_ref)

    acc_ref[...] += jnp.dot(a_ref[...], b_ref[...],
                            preferred_element_type=jnp.float32)

    @pl.when(pl.program_id(2) == pl.num_programs(2) - 1)
    def _fin():
        r = acc_ref[...] * s_ref[...] + bias_ref[...]
        if relu:
            r = jnp.maximum(r, 0.0)
        o_ref[...] = r.astype(o_ref.dtype)


def _mm_res_kernel(a_ref, b_ref, s_ref, bias_ref, res_ref, o_ref, acc_ref):
    """Bottleneck conv3 epilogue: o = relu((a @ b) * scale + bias + residual)."""
    @pl.when(pl.program_id(2) == 0)
    def _init():
        acc_ref[...] = jnp.zeros_like(acc_ref)

    acc_ref[...] += jnp.dot(a_ref[...], b_ref[...],
                            preferred_element_type=jnp.float32)

    @pl.when(pl.program_id(2) == pl.num_programs(2) - 1)
    def _fin():
        r = acc_ref[...] * s_ref[...] + bias_ref[...] \
            + res_ref[...].astype(jnp.float32)
        o_ref[...] = jnp.maximum(r, 0.0).astype(o_ref.dtype)


def _tapconv_kernel(x_hbm, w_ref, s_ref, bias_ref, o_ref,
                    acc_ref, a_buf, sem, *, tm, wp, sp, halo, relu):
    """3x3x3 stride-1 conv: grid = (m_blocks, n_blocks, 27 taps).

    The flattened, zero-padded activation stays in HBM; for each tap the
    shifted row window is DMA'd into a double-buffered VMEM scratch and
    accumulated with the per-tap weight slab on the MXU (no 27x im2col)."""
    i = pl.program_id(0)
    t = pl.program_id(2)
    nt = pl.num_programs(2)
    slot = t % 2

    def issue(tt, dst_slot):
        a = tt // 9
        b = (tt // 3) % 3
        c = tt % 3
        off = (a - 1) * sp + (b - 1) * wp + (c - 1)
        row = halo + i * tm + off
        pltpu.make_async_copy(x_hbm.at[pl.ds(row, tm)],
                              a_buf.at[dst_slot], sem.at[dst_slot]).start()

    @pl.when(t == 0)
    def _init():
        acc_ref[...] = jnp.zeros_like(acc_ref)
        issue(0, 0)

    # wait for the tap we are about to consume
    pltpu.make_async_copy(x_hbm.at[pl.ds(0, tm)],
                          a_buf.at[slot], sem.at[slot]).wait()

    # prefetch the next tap into the other buffer (overlap DMA with compute)
    @pl.when(t + 1 < nt)
    def _prefetch():
        issue(t + 1, 1 - slot)

    acc_ref[...] += jnp.dot(a_buf[slot], w_ref[0],
                            preferred_element_type=jnp.float32)

    @pl.when(t == nt - 1)
    def _fin():
        r = acc_ref[...] * s_ref[...] + bias_ref[...]
        if relu:
            r = jnp.maximum(r, 0.0)
        o_ref[...] = r.astype(o_ref.dtype)


def _max3_kernel(a_ref, b_ref, c_ref, o_ref):
    o_ref[...] = jnp.maximum(jnp.maximum(a_ref[...], b_ref[...]), c_ref[...])


def _mean_kernel(x_ref, o_ref, *, inv_s):
    o_ref[...] = jnp.sum(x_ref[...].astype(jnp.float32), axis=1) * inv_s


# ----------------------------------------------------------------------------
# Matmul wrapper (fused BN/bias/ReLU/residual epilogue)
# ----------------------------------------------------------------------------
def _matmul_core(a, b, scale, bias, res=None, *, relu=False):
    M, K = a.shape
    K2, N = b.shape
    assert K == K2
    tm, Mp = _choose_tile(M, 512, 8)
    tk, Kp = _choose_tile(K, 512, 128)
    tn, Np = _choose_tile(N, 256, 128)

    a = a.astype(jnp.bfloat16)
    b = b.astype(jnp.bfloat16)
    if (Mp, Kp) != (M, K):
        a = jnp.pad(a, ((0, Mp - M), (0, Kp - K)))
    if (Kp, Np) != (K, N):
        b = jnp.pad(b, ((0, Kp - K), (0, Np - N)))
    if Np != N:
        scale = jnp.pad(scale, (0, Np - N))
        bias = jnp.pad(bias, (0, Np - N))
    scale = scale.reshape(1, Np).astype(jnp.float32)
    bias = bias.reshape(1, Np).astype(jnp.float32)

    grid = (Mp // tm, Np // tn, Kp // tk)
    in_specs = [
        pl.BlockSpec((tm, tk), lambda i, j, k: (i, k)),
        pl.BlockSpec((tk, tn), lambda i, j, k: (k, j)),
        pl.BlockSpec((1, tn), lambda i, j, k: (0, j)),
        pl.BlockSpec((1, tn), lambda i, j, k: (0, j)),
    ]
    out_spec = pl.BlockSpec((tm, tn), lambda i, j, k: (i, j))
    scratch = [pltpu.VMEM((tm, tn), jnp.float32)]
    cparams = pltpu.CompilerParams(
        dimension_semantics=("parallel", "parallel", "arbitrary"),
        vmem_limit_bytes=_VMEM_LIMIT)
    out_shape = jax.ShapeDtypeStruct((Mp, Np), jnp.bfloat16)

    if res is None:
        out = pl.pallas_call(
            functools.partial(_mm_kernel, relu=relu),
            out_shape=out_shape,
            grid_spec=pltpu.PrefetchScalarGridSpec(
                num_scalar_prefetch=0, grid=grid,
                in_specs=in_specs, out_specs=out_spec,
                scratch_shapes=scratch),
            compiler_params=cparams,
        )(a, b, scale, bias)
    else:
        res = res.astype(jnp.bfloat16)
        if res.shape != (Mp, Np):
            res = jnp.pad(res, ((0, Mp - M), (0, Np - N)))
        out = pl.pallas_call(
            _mm_res_kernel,
            out_shape=out_shape,
            grid_spec=pltpu.PrefetchScalarGridSpec(
                num_scalar_prefetch=0, grid=grid,
                in_specs=in_specs
                + [pl.BlockSpec((tm, tn), lambda i, j, k: (i, j))],
                out_specs=out_spec, scratch_shapes=scratch),
            compiler_params=cparams,
        )(a, b, scale, bias, res)

    if (Mp, Np) != (M, N):
        out = out[:M, :N]
    return out


_linear = jax.jit(_matmul_core, static_argnames=("relu",))


# ----------------------------------------------------------------------------
# Convolution wrappers
# ----------------------------------------------------------------------------
@functools.partial(jax.jit, static_argnames=("relu",))
def _conv3x3s1(x, w27, scale, bias, *, relu):
    """3x3x3 / stride 1 / pad 1 conv via the tap-accumulation kernel.
    x: (B,D,H,W,Cin), w27: (27,Cin,Cout)."""
    B, D, H, W, Cin = x.shape
    Cout = w27.shape[-1]
    Dp, Hp, Wp = D + 2, H + 2, W + 2
    sp = Hp * Wp
    M = B * Dp * Hp * Wp                 # conv evaluated over the padded grid
    tm = min(512, _rup(M, 8))
    Mp = _rup(M, tm)
    tn, Np = _choose_tile(Cout, 256, 128)
    if Np != Cout:                        # never triggered for this network
        w27 = jnp.pad(w27, ((0, 0), (0, 0), (0, Np - Cout)))
        scale = jnp.pad(scale, (0, Np - Cout))
        bias = jnp.pad(bias, (0, Np - Cout))
    halo = sp + Wp + 1                    # max |tap offset| in flattened rows

    xp = jnp.pad(x.astype(jnp.bfloat16),
                 ((0, 0), (1, 1), (1, 1), (1, 1), (0, 0)))
    xf = jnp.pad(xp.reshape(M, Cin), ((halo, halo + (Mp - M)), (0, 0)))
    scale = scale.reshape(1, Np).astype(jnp.float32)
    bias = bias.reshape(1, Np).astype(jnp.float32)

    grid = (Mp // tm, Np // tn, 27)
    out = pl.pallas_call(
        functools.partial(_tapconv_kernel, tm=tm, wp=Wp, sp=sp, halo=halo,
                          relu=relu),
        out_shape=jax.ShapeDtypeStruct((Mp, Np), jnp.bfloat16),
        grid_spec=pltpu.PrefetchScalarGridSpec(
            num_scalar_prefetch=0, grid=grid,
            in_specs=[
                pl.BlockSpec(memory_space=pl.ANY),                 # x stays in HBM
                pl.BlockSpec((1, Cin, tn), lambda i, j, t: (t, 0, j)),
                pl.BlockSpec((1, tn), lambda i, j, t: (0, j)),
                pl.BlockSpec((1, tn), lambda i, j, t: (0, j)),
            ],
            out_specs=pl.BlockSpec((tm, tn), lambda i, j, t: (i, j)),
            scratch_shapes=[
                pltpu.VMEM((tm, tn), jnp.float32),
                pltpu.VMEM((2, tm, Cin), jnp.bfloat16),
                pltpu.SemaphoreType.DMA((2,)),
            ]),
        compiler_params=pltpu.CompilerParams(
            dimension_semantics=("parallel", "parallel", "arbitrary"),
            vmem_limit_bytes=_VMEM_LIMIT),
    )(xf, w27.astype(jnp.bfloat16), scale, bias)

    y = out[:M, :Cout].reshape(B, Dp, Hp, Wp, Cout)
    return y[:, 1:1 + D, 1:1 + H, 1:1 + W, :]


@functools.partial(jax.jit, static_argnames=("k", "stride", "pad", "relu"))
def _conv_im2col(x, w_flat, scale, bias, *, k, stride, pad, relu):
    """Strided k>1 conv: hierarchical im2col (W, then H, then D) + fused matmul."""
    B, D, H, W, Cin = x.shape
    Cout = w_flat.shape[-1]
    xp = jnp.pad(x.astype(jnp.bfloat16),
                 ((0, 0), (pad, pad), (pad, pad), (pad, pad), (0, 0)))
    Do = (D + 2 * pad - k) // stride + 1
    Ho = (H + 2 * pad - k) // stride + 1
    Wo = (W + 2 * pad - k) // stride + 1
    g = jnp.concatenate(
        [xp[:, :, :, c:c + (Wo - 1) * stride + 1:stride, :] for c in range(k)],
        axis=-1)
    g = jnp.concatenate(
        [g[:, :, b:b + (Ho - 1) * stride + 1:stride, :, :] for b in range(k)],
        axis=-1)
    g = jnp.concatenate(
        [g[:, a:a + (Do - 1) * stride + 1:stride, :, :, :] for a in range(k)],
        axis=-1)
    patches = g.reshape(B * Do * Ho * Wo, k * k * k * Cin)
    y = _matmul_core(patches, w_flat, scale, bias, None, relu=relu)
    return y.reshape(B, Do, Ho, Wo, Cout)


@jax.jit
def _deconv2x2(x, w, b):
    """ConvTranspose3d(kernel=2, stride=2).  w: (Cin, 8*Cout), b: (Cout,)."""
    B, D, H, W, Cin = x.shape
    Co8 = w.shape[-1]
    Cout = Co8 // 8
    ones = jnp.ones((Co8,), jnp.float32)
    b8 = jnp.tile(b.astype(jnp.float32), 8)
    y = _matmul_core(x.reshape(B * D * H * W, Cin), w, ones, b8, None,
                     relu=False)
    y = y.reshape(B, D, H, W, 2, 2, 2, Cout)
    y = jnp.transpose(y, (0, 1, 4, 2, 5, 3, 6, 7))
    return y.reshape(B, 2 * D, 2 * H, 2 * W, Cout)


# ----------------------------------------------------------------------------
# Pooling kernels
# ----------------------------------------------------------------------------
@functools.partial(jax.jit, static_argnames=("axis",))
def _maxpool_axis(x, *, axis):
    """1-D max-pool (kernel 3, stride 2, pad 1) along `axis` of an NDHWC tensor."""
    L = x.shape[axis]
    Lo = (L - 1) // 2 + 1
    pw = [(0, 0)] * x.ndim
    pw[axis] = (1, 1)
    xp = jnp.pad(x, pw, constant_values=float("-inf"))

    def tap(c):
        idx = [slice(None)] * x.ndim
        idx[axis] = slice(c, c + (Lo - 1) * 2 + 1, 2)
        return xp[tuple(idx)]

    t0, t1, t2 = tap(0), tap(1), tap(2)
    shp = t0.shape
    C = shp[-1]
    R = t0.size // C
    flats = [t.reshape(R, C) for t in (t0, t1, t2)]
    tr = min(512, _rup(R, 8))
    Rp = _rup(R, tr)
    if Rp != R:
        flats = [jnp.pad(t, ((0, Rp - R), (0, 0)),
                         constant_values=float("-inf")) for t in flats]
    out = pl.pallas_call(
        _max3_kernel,
        out_shape=jax.ShapeDtypeStruct((Rp, C), x.dtype),
        grid_spec=pltpu.PrefetchScalarGridSpec(
            num_scalar_prefetch=0, grid=(Rp // tr,),
            in_specs=[pl.BlockSpec((tr, C), lambda i: (i, 0))] * 3,
            out_specs=pl.BlockSpec((tr, C), lambda i: (i, 0))),
        compiler_params=pltpu.CompilerParams(
            dimension_semantics=("parallel",), vmem_limit_bytes=_VMEM_LIMIT),
    )(*flats)
    return out[:R].reshape(shp)


def maxpool3d(x):
    """MaxPool3d(kernel=3, stride=2, padding=1), separable over the 3 axes."""
    x = _maxpool_axis(x, axis=3)
    x = _maxpool_axis(x, axis=2)
    x = _maxpool_axis(x, axis=1)
    return x


@jax.jit
def _global_avg_pool(x):
    """AdaptiveAvgPool3d((1,1,1)): (B,D,H,W,C) -> (B,C) float32."""
    B = x.shape[0]
    C = x.shape[-1]
    S = x.shape[1] * x.shape[2] * x.shape[3]
    xr = x.reshape(B, S, C)
    tc = 256 if C % 256 == 0 else (128 if C % 128 == 0 else C)
    return pl.pallas_call(
        functools.partial(_mean_kernel, inv_s=1.0 / S),
        out_shape=jax.ShapeDtypeStruct((B, C), jnp.float32),
        grid_spec=pltpu.PrefetchScalarGridSpec(
            num_scalar_prefetch=0, grid=(C // tc,),
            in_specs=[pl.BlockSpec((B, S, tc), lambda c: (0, 0, c))],
            out_specs=pl.BlockSpec((B, tc), lambda c: (0, c))),
        compiler_params=pltpu.CompilerParams(
            dimension_semantics=("parallel",), vmem_limit_bytes=_VMEM_LIMIT),
    )(xr)


# ----------------------------------------------------------------------------
# Layer glue
# ----------------------------------------------------------------------------
def conv_bn_relu(x, convp, bnp, k, stride, pad, relu, res=None):
    """Conv3d (+ inference-mode BatchNorm3d) (+ ReLU) (+ fused residual add)."""
    w = convp['w']
    cout = w.shape[-1]
    b = convp['b'] if convp['b'] is not None else jnp.zeros((cout,), jnp.float32)
    if bnp is not None:
        s = bnp['gamma'] * jax.lax.rsqrt(bnp['var'] + 1e-5)
        bias = (b - bnp['mean']) * s + bnp['beta']
        scale = s
    else:
        scale = jnp.ones((cout,), jnp.float32)
        bias = b

    if k == 1:
        if stride > 1:
            x = x[:, ::stride, ::stride, ::stride, :]
        B, D, H, W, Cin = x.shape
        r2 = None if res is None else res.reshape(-1, cout)
        y = _linear(x.reshape(-1, Cin), w, scale, bias, r2, relu=relu)
        return y.reshape(B, D, H, W, cout)

    if stride == 1 and k == 3 and pad == 1:
        assert res is None
        return _conv3x3s1(x, w, scale, bias, relu=relu)

    # strided k>1 convs (stem + downsampling 3x3x3): im2col fallback
    cin = x.shape[-1]
    return _conv_im2col(x, w.reshape(k ** 3 * cin, cout), scale, bias,
                        k=k, stride=stride, pad=pad, relu=relu)


def bottleneck_fwd(x, p, stride):
    y = conv_bn_relu(x, p['conv1'], p['bn1'], 1, 1, 0, True)
    y = conv_bn_relu(y, p['conv2'], p['bn2'], 3, stride, 1, True)
    if 'ds' in p:
        idt = conv_bn_relu(x, p['ds'], p['bn_ds'], 1, stride, 0, False)
    else:
        idt = x
    # conv3 + BN + residual add + ReLU fused into one matmul epilogue
    return conv_bn_relu(y, p['conv3'], p['bn3'], 1, 1, 0, True, res=idt)


def layer_fwd(x, blocks, stride):
    for i, blk in enumerate(blocks):
        x = bottleneck_fwd(x, blk, stride if i == 0 else 1)
    return x


def basicblock_fwd(x, p):
    x = conv_bn_relu(x, p['conv1'], p['bn1'], 3, 1, 1, True)
    x = conv_bn_relu(x, p['conv2'], p['bn2'], 3, 1, 1, True)
    return x


def _match_spatial(last, target_shape):
    """Crop / zero-pad `last` (trailing side) to match the skip's spatial size
    (mirrors F.pad with possibly-negative pads)."""
    slices = [slice(None)]
    pads = [(0, 0)]
    for ax in (1, 2, 3):
        d = target_shape[ax] - last.shape[ax]
        if d < 0:
            slices.append(slice(0, target_shape[ax]))
            pads.append((0, 0))
        else:
            slices.append(slice(None))
            pads.append((0, d))
    slices.append(slice(None))
    pads.append((0, 0))
    last = last[tuple(slices)]
    if any(p != (0, 0) for p in pads):
        last = jnp.pad(last, pads)
    return last


def up_conv_fwd(skip, last, p):
    last = _deconv2x2(last, p['deconv']['w'], p['deconv']['b'])
    if skip.shape != last.shape:
        last = _match_spatial(last, skip.shape)
    x = jnp.concatenate([skip, last], axis=-1)
    return basicblock_fwd(x, p['block'])


# ----------------------------------------------------------------------------
# Parameter construction (deterministic He-style init, bf16 weights)
# ----------------------------------------------------------------------------
class Init:
    def __init__(self, seed=0):
        self.key = jax.random.PRNGKey(seed)
        self.count = 0

    def normal(self, shape, scale, dtype=jnp.float32):
        self.count += 1
        k = jax.random.fold_in(self.key, self.count)
        return (jax.random.normal(k, shape, dtype) * scale).astype(dtype)


def make_bn(c):
    return dict(gamma=jnp.ones((c,), jnp.float32),
                beta=jnp.zeros((c,), jnp.float32),
                mean=jnp.zeros((c,), jnp.float32),
                var=jnp.ones((c,), jnp.float32))


def make_conv(ini, cin, cout, k, bias):
    fan = k * k * k * cin
    if k == 1:
        w = ini.normal((cin, cout), math.sqrt(2.0 / fan), jnp.bfloat16)
    else:
        w = ini.normal((k * k * k, cin, cout), math.sqrt(2.0 / fan),
                       jnp.bfloat16)
    b = ini.normal((cout,), 0.01, jnp.float32) if bias else None
    return dict(w=w, b=b)


def make_deconv(ini, cin, cout):
    return dict(w=ini.normal((cin, 8 * cout), math.sqrt(2.0 / (8.0 * cin)),
                             jnp.bfloat16),
                b=ini.normal((cout,), 0.01, jnp.float32))


def make_bottleneck(ini, cin, planes, stride):
    p = dict(conv1=make_conv(ini, cin, planes, 1, False), bn1=make_bn(planes),
             conv2=make_conv(ini, planes, planes, 3, False), bn2=make_bn(planes),
             conv3=make_conv(ini, planes, planes * 4, 1, False),
             bn3=make_bn(planes * 4))
    if stride != 1 or cin != planes * 4:
        p['ds'] = make_conv(ini, cin, planes * 4, 1, False)
        p['bn_ds'] = make_bn(planes * 4)
    return p


def make_layer(ini, cin, planes, nblocks, stride):
    blocks = [make_bottleneck(ini, cin, planes, stride)]
    for _ in range(nblocks - 1):
        blocks.append(make_bottleneck(ini, planes * 4, planes, 1))
    return blocks


def make_basicblock(ini, cin, cout):
    mid = cin
    return dict(conv1=make_conv(ini, cin, mid, 3, True), bn1=make_bn(mid),
                conv2=make_conv(ini, mid, cout, 3, True), bn2=make_bn(cout))


def build_params(num_classes_cls, seed=0):
    ini = Init(seed)
    enc = dict(conv1=make_conv(ini, 1, 64, 7, False), bn1=make_bn(64),
               layer1=make_layer(ini, 64, 64, 3, 1),
               layer2=make_layer(ini, 256, 128, 4, 2),
               layer3=make_layer(ini, 512, 256, 6, 2),
               layer4=make_layer(ini, 1024, 512, 3, 2))
    return dict(
        encoder=enc,
        conv6=make_conv(ini, 2048, 1024, 3, True),
        up1=dict(deconv=make_deconv(ini, 1024, 1024),
                 block=make_basicblock(ini, 2048, 1024)),
        up2=dict(deconv=make_deconv(ini, 1024, 512),
                 block=make_basicblock(ini, 1024, 512)),
        up3=dict(deconv=make_deconv(ini, 512, 256),
                 block=make_basicblock(ini, 512, 256)),
        up4=dict(deconv=make_deconv(ini, 256, 64),
                 block=make_basicblock(ini, 128, 64)),
        uplast=make_deconv(ini, 64, 1),
        cls=dict(w=ini.normal((2048, num_classes_cls),
                              math.sqrt(1.0 / 2048), jnp.bfloat16),
                 b=jnp.zeros((num_classes_cls,), jnp.float32)),
    )


# ----------------------------------------------------------------------------
# Forward pass (NOT wrapped in one giant jit on purpose: per-op jitted
# wrappers keep compile units small and let identical-shape blocks share one
# compilation)
# ----------------------------------------------------------------------------
def forward(params, x_ncdhw):
    x = jnp.transpose(x_ncdhw, (0, 2, 3, 4, 1)).astype(jnp.bfloat16)
    e = params['encoder']

    # Encoder (3D ResNet-50)
    x1 = conv_bn_relu(x, e['conv1'], e['bn1'], 7, 2, 3, True)
    x2 = layer_fwd(maxpool3d(x1), e['layer1'], 1)
    x3 = layer_fwd(x2, e['layer2'], 2)
    x4 = layer_fwd(x3, e['layer3'], 2)
    x5 = layer_fwd(x4, e['layer4'], 2)

    # Decoder (dropout = identity, inference semantics)
    x6 = conv_bn_relu(x5, params['conv6'], None, 3, 1, 1, False)
    x7 = up_conv_fwd(x4, x6, params['up1'])
    x8 = up_conv_fwd(x3, x7, params['up2'])
    x9 = up_conv_fwd(x2, x8, params['up3'])
    x10 = up_conv_fwd(x1, x9, params['up4'])
    seg = _deconv2x2(x10, params['uplast']['w'], params['uplast']['b'])

    # Classification head: AdaptiveAvgPool3d((1,1,1)) + Linear(2048, ncls)
    pooled = _global_avg_pool(x5)
    cls_w = params['cls']['w']
    cls = _linear(pooled, cls_w,
                  jnp.ones((cls_w.shape[-1],), jnp.float32),
                  params['cls']['b'], None, relu=False)

    seg = jnp.transpose(seg, (0, 4, 1, 2, 3)).astype(jnp.float32)
    return seg, cls.astype(jnp.float32)


# ----------------------------------------------------------------------------
if __name__ == "__main__":
    NUM_CLASSES_SEG = 1   # unused by forward (matches the PyTorch module)
    NUM_CLASSES_CLS = 3

    key = jax.random.PRNGKey(0)
    # Small input consistent with the module's (2, 1, D, H, W) interface.
    x = jax.random.normal(key, (2, 1, 16, 16, 16), jnp.float32)

    params = build_params(NUM_CLASSES_CLS, seed=0)

    seg_out, cls_out = forward(params, x)
    jax.block_until_ready((seg_out, cls_out))

    assert seg_out.shape == (2, 1, 16, 16, 16), seg_out.shape
    assert cls_out.shape == (2, NUM_CLASSES_CLS), cls_out.shape
    print("KERNEL_OK")
</pallas_src>

<mosaic_0001>
module attributes {stable_mosaic.version = 11 : i64} {
  func.func @_mm_kernel(%arg0: i32, %arg1: i32, %arg2: i32, %arg3: memref<512x343xbf16, #tpu.memory_space<vmem>>, %arg4: memref<343x64xbf16, #tpu.memory_space<vmem>>, %arg5: memref<1x64xf32, #tpu.memory_space<vmem>>, %arg6: memref<1x64xf32, #tpu.memory_space<vmem>>, %arg7: memref<512x64xbf16, #tpu.memory_space<vmem>>, %arg8: memref<512x64xf32, #tpu.memory_space<vmem>>) attributes {dimension_semantics = [#tpu.dimension_semantics<parallel>, #tpu.dimension_semantics<parallel>, #tpu.dimension_semantics<arbitrary>], iteration_bounds = array<i64: 2, 1, 1>, scalar_prefetch = 0 : i64, scratch_operands = 1 : i64, tpu.core_type = #tpu.core_type<tc>, window_params = [{transform_indices = @transform_0, window_bounds = array<i64: 512, 343>}, {transform_indices = @transform_1, window_bounds = array<i64: 343, 64>}, {transform_indices = @transform_2, window_bounds = array<i64: 1, 64>}, {transform_indices = @transform_3, window_bounds = array<i64: 1, 64>}, {transform_indices = @transform_4, window_bounds = array<i64: 512, 64>}]} {
    %c0_i32 = arith.constant 0 : i32
    %0 = arith.cmpi eq, %arg2, %c0_i32 : i32
    %1 = arith.extui %0 : i1 to i32
    %c0_i32_0 = arith.constant 0 : i32
    %2 = arith.cmpi ne, %1, %c0_i32_0 : i32
    scf.if %2 {
      %cst_10 = arith.constant 0.000000e+00 : f32
      %12 = vector.broadcast %cst_10 : f32 to vector<512x64xf32>
      %c0_11 = arith.constant 0 : index
      %c0_12 = arith.constant 0 : index
      %13 = vector.load %arg8[%c0_11, %c0_12] : memref<512x64xf32, #tpu.memory_space<vmem>>, vector<512x64xf32>
      tpu.vector_store %arg8[%c0_11, %c0_12], %12 {strides = array<i32>} : memref<512x64xf32, #tpu.memory_space<vmem>>, vector<512x64xf32>,
    } else {
    }
    %c0 = arith.constant 0 : index
    %c0_1 = arith.constant 0 : index
    %3 = vector.load %arg8[%c0, %c0_1] : memref<512x64xf32, #tpu.memory_space<vmem>>, vector<512x64xf32>
    %c0_2 = arith.constant 0 : index
    %c0_3 = arith.constant 0 : index
    %4 = vector.load %arg3[%c0_2, %c0_3] : memref<512x343xbf16, #tpu.memory_space<vmem>>, vector<512x343xbf16>
    %c0_4 = arith.constant 0 : index
    %c0_5 = arith.constant 0 : index
    %5 = vector.load %arg4[%c0_4, %c0_5] : memref<343x64xbf16, #tpu.memory_space<vmem>>, vector<343x64xbf16>
    %cst = arith.constant dense<0.000000e+00> : vector<512x64xf32>
    %6 = tpu.matmul %4, %5, %cst {dimension_numbers = #tpu.dot_dimension_numbers<[1], [0], [0], [1], [0, 0, 1, 1], [], []>} : vector<512x343xbf16>, vector<343x64xbf16>, vector<512x64xf32> -> vector<512x64xf32>
    %7 = arith.addf %3, %6 : vector<512x64xf32>
    %c0_6 = arith.constant 0 : index
    %c0_7 = arith.constant 0 : index
    %8 = vector.load %arg8[%c0_6, %c0_7] : memref<512x64xf32, #tpu.memory_space<vmem>>, vector<512x64xf32>
    tpu.vector_store %arg8[%c0_6, %c0_7], %7 {strides = array<i32>} : memref<512x64xf32, #tpu.memory_space<vmem>>, vector<512x64xf32>,
    %c0_i32_8 = arith.constant 0 : i32
    %9 = arith.cmpi eq, %arg2, %c0_i32_8 : i32
    %10 = arith.extui %9 : i1 to i32
    %c0_i32_9 = arith.constant 0 : i32
    %11 = arith.cmpi ne, %10, %c0_i32_9 : i32
    scf.if %11 {
      %c0_10 = arith.constant 0 : index
      %c0_11 = arith.constant 0 : index
      %12 = vector.load %arg8[%c0_10, %c0_11] : memref<512x64xf32, #tpu.memory_space<vmem>>, vector<512x64xf32>
      %c0_12 = arith.constant 0 : index
      %c0_13 = arith.constant 0 : index
      %13 = vector.load %arg5[%c0_12, %c0_13] : memref<1x64xf32, #tpu.memory_space<vmem>>, vector<1x64xf32>
      %14 = vector.broadcast %13 : vector<1x64xf32> to vector<512x64xf32>
      %15 = arith.mulf %12, %14 : vector<512x64xf32>
      %c0_14 = arith.constant 0 : index
      %c0_15 = arith.constant 0 : index
      %16 = vector.load %arg6[%c0_14, %c0_15] : memref<1x64xf32, #tpu.memory_space<vmem>>, vector<1x64xf32>
      %17 = vector.broadcast %16 : vector<1x64xf32> to vector<512x64xf32>
      %18 = arith.addf %15, %17 : vector<512x64xf32>
      %cst_16 = arith.constant 0.000000e+00 : f32
      %19 = vector.broadcast %cst_16 : f32 to vector<512x64xf32>
      %20 = arith.maximumf %18, %19 : vector<512x64xf32>
      %21 = arith.truncf %20 : vector<512x64xf32> to vector<512x64xbf16>
      %c0_17 = arith.constant 0 : index
      %c0_18 = arith.constant 0 : index
      %22 = vector.load %arg7[%c0_17, %c0_18] : memref<512x64xbf16, #tpu.memory_space<vmem>>, vector<512x64xbf16>
      tpu.vector_store %arg7[%c0_17, %c0_18], %21 {strides = array<i32>} : memref<512x64xbf16, #tpu.memory_space<vmem>>, vector<512x64xbf16>,
    } else {
    }
    return
  }
  func.func @transform_0(%arg0: i32, %arg1: i32, %arg2: i32) -> (i32, i32) {
    %c0_i32 = arith.constant 0 : i32
    return %arg0, %arg2 : i32, i32
  }
  func.func @transform_1(%arg0: i32, %arg1: i32, %arg2: i32) -> (i32, i32) {
    %c0_i32 = arith.constant 0 : i32
    return %arg2, %arg1 : i32, i32
  }
  func.func @transform_2(%arg0: i32, %arg1: i32, %arg2: i32) -> (i32, i32) {
    %c0_i32 = arith.constant 0 : i32
    %c0_i32_0 = arith.constant 0 : i32
    return %c0_i32, %arg1 : i32, i32
  }
  func.func @transform_3(%arg0: i32, %arg1: i32, %arg2: i32) -> (i32, i32) {
    %c0_i32 = arith.constant 0 : i32
    %c0_i32_0 = arith.constant 0 : i32
    return %c0_i32, %arg1 : i32, i32
  }
  func.func @transform_4(%arg0: i32, %arg1: i32, %arg2: i32) -> (i32, i32) {
    %c0_i32 = arith.constant 0 : i32
    return %arg0, %arg1 : i32, i32
  }
}

</mosaic_0001>

<bundles_post_ra>
// kernel: _conv_im2col.1
= control target key start
LH: loop header
LB: loop body
LE: loop exit
PB: predicated region body
PF: predicated region fallthrough
CT: control target
= control target key end

     0   :  { %9 = vsyncpa [#allocation4], 0  ;;  %s4506_s0 = inlined_call_operand.vmem [shape: bf16[1024,343], index: 0, kind: input, shape index: {}]   ;;  %s4507_s1 = inlined_call_operand.vmem [shape: bf16[343,64], index: 1, kind: input, shape index: {}]   ;;  %s4508_s2 = inlined_call_operand.vmem [shape: f32[1,64], index: 2, kind: input, shape index: {}]   ;;  %s4509_s3 = inlined_call_operand.vmem [shape: f32[1,64], index: 3, kind: input, shape index: {}]   ;;  %s4510_s4 = inlined_call_operand.hbm [shape: bf16[1024,64], index: 4, kind: output, shape index: {}]  }
   0x1   :  { %11 = vsyncpa [#allocation4 + $0x1], 0  ;;  %s3524_s15 = smov 0   ;;  %s3526_s16 = smov 0  }
   0x2   :  { %s3528_s17 = smov 0   ;;  %s3530_s18 = smov 0  }
   0x3   :  { %s3532_s19 = smov 0   ;;  %s3534_s20 = smov 0  }
   0x4 LB: > { %s2757_s21 = sadd.s32 4294967295, %s3491_s20   ;;  %s2758_s22 = sadd.s32 4294967294, %s3491_s20   ;;  %s3491_s20 = sphi %s3534_s20, %s17_s20   ;;  %s3487_s19 = sphi %s3532_s19, %s4517_s19   ;;  %s3483_s18 = sphi %s3530_s18, %s4516_s18   ;;  %s3479_s17 = sphi %s3528_s17, %s4515_s17   ;;  %s3475_s16 = sphi %s3526_s16, %s4514_s16   ;;  %s3471_s15 = sphi %s3524_s15, %s4513_s15  }
   0x5   : > { %s36_s23 = sadd.s32 1, %s3487_s19  ;;  %s153_s24 = sadd.s32 1, %s3479_s17 }
   0x6   : > { %p38_p0 = scmp.ge.s32.totalorder %s36_s23, 2  ;;  %p163_p1 = scmp.ne.s32.totalorder %s3479_s17, %s3475_s16 }
   0x7   : > { %p164_p2 = scmp.eq.s32.totalorder %s2757_s21, 1  ;;  %p169_p3 = scmp.ne.s32.totalorder %s3475_s16, %s3471_s15 }
   0x8   : > { %s4519_s23 = smov (%p38_p0, %s36_s23), 0  ;;  %p170_p5 = scmp.eq.s32.totalorder %s2758_s22, 1 }
   0x9   : > { %p3564_p4 = por %p164_p2, %p163_p1  ;;  %s148_s26 = ssub.s32 %s3487_s19, %s4519_s23 }
   0xa   : > { %p2764_p6 = scmp.ge.s32.totalorder %s3491_s20, 1  ;;  %p151_p7 = scmp.eq.s32.totalorder %s148_s26, 0 }
   0xb   : > { %p3571_p8 = por %p170_p5, %p169_p3  ;;  %p227_p9 = scmp.lt.s32.totalorder %s3491_s20, 3 }
   0xc   : > { %s3577_s28 = scalar_select %p151_p7, %s3479_s17, %s153_s24  }
   0xd   : > { %p228_p10 = pnand %p2764_p6, %p227_p9 }
   0xe   : > { %v3261_v0 = vld [vmem:[%s4507_s1] sm:$0xff] (!%p228_p10)   ;;  %v3493_v1 = vmov (!%p228_p10), 0   ;;  %s2766_s5 = sshll.u32 (!%p228_p10), %s3483_s18, 6  ;;  %v3262_v2 = vld [vmem:[%s4507_s1 + $0x8] sm:$0xff] (!%p228_p10)   ;;  %v3263_v3 = vld [vmem:[%s4507_s1 + $0x10] sm:$0xff] (!%p228_p10)   ;;  %vm1311_vm0 = vcmask (!%p228_p10), 1042432  }
   0xf   : > { %231 = sbr.rel (%p228_p10) target bundleno = 520 (0x208), region = 36  ;;  %1318 = vmatprep.subr.bf16.mxu0 (!%p228_p10), %v3493_v1  ;;  %3168 = vmatprep.subr.bf16.mxu1 (!%p228_p10), %v3493_v1  ;;  %p274_p11 = scmp.lt.s32.totalorder (!%p228_p10), %s2766_s5, 127  ;;  %v3264_v4 = vld [vmem:[%s4507_s1 + $0x18] sm:$0xff] (!%p228_p10)   ;;  %v3265_v5 = vld [vmem:[%s4507_s1 + $0x20] sm:$0xff] (!%p228_p10)   ;;  %v3266_v7 = vld [vmem:[%s4507_s1 + $0x28] sm:$0xff] (!%p228_p10)   ;;  %vm1312_vm1 = vcmask (!%p228_p10), 1043456  }
  0x10   : > { %1319 = vmatpush1.bf16.msra.mxu0 (!%p228_p10), %v3261_v0  ;;  %3184 = vmatpush1.bf16.msra.mxu1 (!%p228_p10), %v3261_v0  ;;  %v3267_v9 = vld [vmem:[%s4507_s1 + $0x30] sm:$0xff] (!%p228_p10)   ;;  %v3268_v10 = vld [vmem:[%s4507_s1 + $0x38] sm:$0xff] (!%p228_p10)   ;;  %v3269_v11 = vld [vmem:[%s4507_s1 + $0x40] sm:$0xff] (!%p228_p10)   ;;  %v3494_v31 = vmov (!%p228_p10), 65535   ;;  %vm1214_vm2 = vcmask (!%p228_p10), 711680   ;;  %vm305_vm3 = vcmask (!%p228_p10), 523264  }
  0x11   : > { %1320 = vmatprep.subr.bf16.mxu0 (!%p228_p10), %v3493_v1  ;;  %3169 = vmatprep.subr.bf16.mxu1 (!%p228_p10), %v3493_v1  ;;  %v3270_v12 = vld [vmem:[%s4507_s1 + $0x48] sm:$0xff] (!%p228_p10)   ;;  %v3271_v13 = vld [vmem:[%s4507_s1 + $0x50] sm:$0xff] (!%p228_p10)   ;;  %v3272_v14 = vld [vmem:[%s4507_s1 + $0x58] sm:$0xff] (!%p228_p10)   ;;  %v1313_v32 = vsel (!%p228_p10), %vm1311_vm0, 4294967295, %v3494_v31  ;;  %s269_s7 = sand.u32 (!%p228_p10), 1, %s3475_s16   ;;  %vm2554_vm4 = vcmask (!%p228_p10), 519168  }
  0x12   : > { %v3273_v15 = vld [vmem:[%s4507_s1 + $0x60] sm:$0xff] (!%p228_p10)   ;;  %v3274_v16 = vld [vmem:[%s4507_s1 + $0x68] sm:$0xff] (!%p228_p10)   ;;  %v3275_v17 = vld [vmem:[%s4507_s1 + $0x70] sm:$0xff] (!%p228_p10)   ;;  %v1314_v36 = vsel (!%p228_p10), %vm1312_vm1, %v1313_v32, 0  ;;  %s4049_s10 = sshll.u32 (!%p228_p10), %s269_s7, 8  ;;  %s3053_s22 = sshll.u32 (!%p228_p10), %s3483_s18, 12 }
  0x13   : > { %v3276_v18 = vld [vmem:[%s4507_s1 + $0x78] sm:$0xff] (!%p228_p10)   ;;  %v3283_v19 = vld [vmem:[%s4507_s1 + $0x80] sm:$0xff] (!%p228_p10)   ;;  %v3290_v24 = vld [vmem:[%s4507_s1 + $0x88] sm:$0xff] (!%p228_p10)   ;;  %s4068_s11 = scalar_lea.vmem (!%p228_p10), [#allocation3], %s4049_s10  ;;  %s4446_s18 = scalar_lea.hbm (!%p228_p10), %s4510_s4, %s3053_s22 }
  0x14   : > { %1321 = vmatpush1.bf16.msra.mxu0 (!%p228_p10), %v3262_v2  ;;  %3185 = vmatpush1.bf16.msra.mxu1 (!%p228_p10), %v3262_v2  ;;  %v3297_v25 = vld [vmem:[%s4507_s1 + $0x90] sm:$0xff] (!%p228_p10)   ;;  %v3310_v30 = vld [vmem:[%s4507_s1 + $0x98] sm:$0xff] (!%p228_p10)   ;;  %v3317_v34 = vld [vmem:[%s4507_s1 + $0xa0] sm:$0xff] (!%p228_p10)   ;;  %s2634_s26 = sshll.u32 (!%p228_p10), %s4068_s11, 4  ;;  %s3496_s6 = smov (!%p228_p10), [#allocation3]   ;;  %s4448_s26 = int_to_ptr.vmem [resolvable:$true] %s2634_s26 }
  0x15   : > { %1322 = vmatprep.subr.bf16.mxu0 (!%p228_p10), %v3493_v1  ;;  %3170 = vmatprep.subr.bf16.mxu1 (!%p228_p10), %v3493_v1  ;;  %v3324_v35 = vld [vmem:[%s4507_s1 + $0xa8] ss:$0 sps:$4 sm:$0xff] (!%p228_p10)   ;;  %s3417_s8 = sshll.u32 (!%p228_p10), %s3496_s6, 4  ;;  %s3418_s8 = int_to_ptr.vmem [resolvable:$false] %s3417_s8 }
  0x16   : > { %s4521_s5 = smov (!%p274_p11, %s2766_s5), 127  ;;  %v1316_v40 = vand.u32 %v3324_v35, %v1314_v36  ;;  %s3419_s9 = scalar_lea.vmem %s3418_s8, 8192 }
  0x17   : > { %s3200_s12 = smul.u32 12, %s4521_s5  ;;  %s4460_s5 = scalar_lea.sflag [#allocation4], %s269_s7 }
  0x18   : > { %1323 = vmatpush1.bf16.msra.mxu0 %v3263_v3  ;;  %3186 = vmatpush1.bf16.msra.mxu1 %v3263_v3  ;;  %p3420_p1 = scmp.lt.s32.totalorder %s4448_s26, %s3418_s8 }
  0x19   : > { %1324 = vmatprep.subr.bf16.mxu0 %v3493_v1  ;;  %3171 = vmatprep.subr.bf16.mxu1 %v3493_v1  ;;  %s3606_s24 = scalar_lea.vmem %s4506_s0, %s3200_s12 }
  0x1a   : > { %v3279_v6 = vld [vmem:[%s3606_s24 + $0x4] ss:$12 sps:$4 sm:$0xff]   ;;  %v3277_v20 = vld [vmem:[%s3606_s24] ss:$12 sps:$4 sm:$0xff]   ;;  %v3284_v22 = vld [vmem:[%s3606_s24 + $0x1c] ss:$12 sps:$4 sm:$0xff]  }
  0x1b   : > { %v3282_v8 = vld [vmem:[%s3606_s24 + $0x244] ss:$12 sps:$4 sm:$0xff]   ;;  %1350 = vmatprep.mubr.bf16.mxu0 %v3279_v6  ;;  %v3280_v21 = vld [vmem:[%s3606_s24 + $0x240] ss:$12 sps:$4 sm:$0xff]   ;;  %v3286_v23 = vld [vmem:[%s3606_s24 + $0x25c] ss:$12 sps:$4 sm:$0xff]  }
  0x1c   : > { %1325 = vmatpush1.bf16.msra.mxu0 %v3264_v4  ;;  %3187 = vmatpush1.bf16.msra.mxu1 %v3264_v4  ;;  %v3288_v26 = vld [vmem:[%s3606_s24 + $0x18] ss:$12 sps:$4 sm:$0xff]   ;;  %v3291_v28 = vld [vmem:[%s3606_s24 + $0x34] ss:$12 sps:$4 sm:$0xff]   ;;  %v3295_v33 = vld [vmem:[%s3606_s24 + $0x30] ss:$12 sps:$4 sm:$0xff]  }
  0x1d   : > { %1326 = vmatprep.subr.bf16.mxu0 %v3493_v1  ;;  %3172 = vmatprep.subr.bf16.mxu1 %v3493_v1  ;;  %v3289_v27 = vld [vmem:[%s3606_s24 + $0x258] ss:$12 sps:$4 sm:$0xff]   ;;  %v3293_v29 = vld [vmem:[%s3606_s24 + $0x274] ss:$12 sps:$4 sm:$0xff]   ;;  %v3296_v37 = vld [vmem:[%s3606_s24 + $0x270] ss:$12 sps:$4 sm:$0xff]  }
  0x1e   : > { %1542 = vmatprep.mubr.bf16.mxu1 %v3282_v8  ;;  %v3298_v38 = vld [vmem:[%s3606_s24 + $0x4c] ss:$12 sps:$4 sm:$0xff]   ;;  %v3302_v41 = vld [vmem:[%s3606_s24 + $0x48] ss:$12 sps:$4 sm:$0xff]   ;;  %v3304_v43 = vld [vmem:[%s3606_s24 + $0x64] ss:$12 sps:$4 sm:$0xff]  }
  0x1f   : > { %v3300_v39 = vld [vmem:[%s3606_s24 + $0x28c] ss:$12 sps:$4 sm:$0xff]   ;;  %v3303_v42 = vld [vmem:[%s3606_s24 + $0x288] ss:$12 sps:$4 sm:$0xff]   ;;  %v3306_v44 = vld [vmem:[%s3606_s24 + $0x2a4] ss:$12 sps:$4 sm:$0xff]  }
  0x20   : > { %1327 = vmatpush1.bf16.msra.mxu0 %v3265_v5  ;;  %3188 = vmatpush1.bf16.msra.mxu1 %v3265_v5  ;;  %v3308_v45 = vld [vmem:[%s3606_s24 + $0x60] ss:$12 sps:$4 sm:$0xff]   ;;  %v3311_v47 = vld [vmem:[%s3606_s24 + $0x7c] ss:$12 sps:$4 sm:$0xff]   ;;  %v3315_v49 = vld [vmem:[%s3606_s24 + $0x78] ss:$12 sps:$4 sm:$0xff]  }
  0x21   : > { %1328 = vmatprep.subr.bf16.mxu0 %v3493_v1  ;;  %3173 = vmatprep.subr.bf16.mxu1 %v3493_v1  ;;  %v3309_v46 = vld [vmem:[%s3606_s24 + $0x2a0] ss:$12 sps:$4 sm:$0xff]   ;;  %v3313_v48 = vld [vmem:[%s3606_s24 + $0x2bc] ss:$12 sps:$4 sm:$0xff]   ;;  %v3316_v50 = vld [vmem:[%s3606_s24 + $0x2b8] ss:$12 sps:$4 sm:$0xff]  }
  0x22   : > { %v3318_v51 = vld [vmem:[%s3606_s24 + $0x94] ss:$12 sps:$4 sm:$0xff]   ;;  %v3322_v53 = vld [vmem:[%s3606_s24 + $0x90] ss:$12 sps:$4 sm:$0xff]   ;;  %v3325_v55 = vld [vmem:[%s3606_s24 + $0xac] ss:$12 sps:$4 sm:$0xff]  }
  0x23   : > { %v3320_v52 = vld [vmem:[%s3606_s24 + $0x2d4] ss:$12 sps:$4 sm:$0xff]   ;;  %v3323_v54 = vld [vmem:[%s3606_s24 + $0x2d0] ss:$12 sps:$4 sm:$0xff]   ;;  %v3327_v56 = vld [vmem:[%s3606_s24 + $0x2ec] ss:$12 sps:$4 sm:$0xff]  }
  0x24   : > { %1329 = vmatpush1.bf16.msra.mxu0 %v3266_v7  ;;  %3189 = vmatpush1.bf16.msra.mxu1 %v3266_v7  ;;  %v3329_v57 = vld [vmem:[%s3606_s24 + $0xa8] ss:$12 sps:$4 sm:$0xff]   ;;  %v3331_v59 = vld [vmem:[%s3606_s24 + $0xc4] ss:$12 sps:$4 sm:$0xff]   ;;  %v3334_v61 = vld [vmem:[%s3606_s24 + $0xc0] ss:$12 sps:$4 sm:$0xff]  }
  0x25   : > { %1330 = vmatprep.subr.bf16.mxu0 %v3493_v1  ;;  %3174 = vmatprep.subr.bf16.mxu1 %v3493_v1  ;;  %v3330_v58 = vld [vmem:[%s3606_s24 + $0x2e8] ss:$12 sps:$4 sm:$0xff]   ;;  %v3335_v62 = vld [vmem:[%s3606_s24 + $0x20] ss:$12 sps:$4 sm:$0xff]   ;;  %v3338_v0 = vld [vmem:[%s3606_s24 + $0x38] ss:$12 sps:$4 sm:$0xff]  }
  0x26   : > { %v3333_v60 = vld [vmem:[%s3606_s24 + $0x8] ss:$12 sps:$4 sm:$0xff]   ;;  %v3340_v2 = vld [vmem:[%s3606_s24 + $0x50] ss:$12 sps:$4 sm:$0xff]   ;;  %v3345_v6 = vld [vmem:[%s3606_s24 + $0x80] ss:$12 sps:$4 sm:$0xff]  }
  0x27   : > { %v3336_v63 = vld [vmem:[%s3606_s24 + $0xdc] ss:$12 sps:$4 sm:$0xff]   ;;  %v3341_v3 = vld [vmem:[%s3606_s24 + $0xf4] ss:$12 sps:$4 sm:$0xff]   ;;  %v3346_v7 = vld [vmem:[%s3606_s24 + $0x10c] ss:$12 sps:$4 sm:$0xff]  }
  0x28   : > { %1331 = vmatpush1.bf16.msra.mxu0 %v3267_v9  ;;  %3190 = vmatpush1.bf16.msra.mxu1 %v3267_v9  ;;  %v3343_v4 = vld [vmem:[%s3606_s24 + $0x68] ss:$12 sps:$4 sm:$0xff]   ;;  %v3344_v5 = vld [vmem:[%s3606_s24 + $0xf0] ss:$12 sps:$4 sm:$0xff]   ;;  %v3348_v8 = vld [vmem:[%s3606_s24 + $0x98] ss:$12 sps:$4 sm:$0xff]  }
  0x29   : > { %1332 = vmatprep.subr.bf16.mxu0 %v3493_v1  ;;  %3175 = vmatprep.subr.bf16.mxu1 %v3493_v1  ;;  %v3349_v9 = vld [vmem:[%s3606_s24 + $0x108] ss:$12 sps:$4 sm:$0xff]   ;;  %v3378_v32 = vld [vmem:[%s3606_s24 + $0x1b8] ss:$12 sps:$4 sm:$0xff]  }
  0x2a   : > { %v3376_v31 = vld [vmem:[%s3606_s24 + $0x19c] ss:$12 sps:$4 sm:$0xff]   ;;  %v3381_v35 = vld [vmem:[%s3606_s24 + $0x1b4] ss:$12 sps:$4 sm:$0xff]  }
  0x2b   : > { %v3383_v36 = vld [vmem:[%s3606_s24 + $0x1e8] ss:$12 sps:$4 sm:$0xff]  }
  0x2c   : > { %1333 = vmatpush1.bf16.msra.mxu0 %v3268_v10  ;;  %3191 = vmatpush1.bf16.msra.mxu1 %v3268_v10  ;;  %v3350_v10 = vld [vmem:[%s3606_s24 + $0xb0] ss:$12 sps:$4 sm:$0xff]  }
  0x2d   : > { %1334 = vmatprep.subr.bf16.mxu0 %v3493_v1  ;;  %3176 = vmatprep.subr.bf16.mxu1 %v3493_v1 }
  0x30   : > { %1335 = vmatpush1.bf16.msra.mxu0 %v3269_v11  ;;  %3192 = vmatpush1.bf16.msra.mxu1 %v3269_v11  ;;  %v3351_v11 = vld [vmem:[%s3606_s24 + $0x124] ss:$12 sps:$4 sm:$0xff]  }
  0x31   : > { %1336 = vmatprep.subr.bf16.mxu0 %v3493_v1  ;;  %3177 = vmatprep.subr.bf16.mxu1 %v3493_v1 }
  0x34   : > { %1337 = vmatpush1.bf16.msra.mxu0 %v3270_v12  ;;  %3193 = vmatpush1.bf16.msra.mxu1 %v3270_v12  ;;  %v3353_v12 = vld [vmem:[%s3606_s24 + $0xc8] ss:$12 sps:$4 sm:$0xff]  }
  0x35   : > { %1338 = vmatprep.subr.bf16.mxu0 %v3493_v1  ;;  %3178 = vmatprep.subr.bf16.mxu1 %v3493_v1 }
  0x38   : > { %1339 = vmatpush1.bf16.msra.mxu0 %v3271_v13  ;;  %3194 = vmatpush1.bf16.msra.mxu1 %v3271_v13  ;;  %v3354_v13 = vld [vmem:[%s3606_s24 + $0x120] ss:$12 sps:$4 sm:$0xff]  }
  0x39   : > { %1340 = vmatprep.subr.bf16.mxu0 %v3493_v1  ;;  %3179 = vmatprep.subr.bf16.mxu1 %v3493_v1 }
  0x3c   : > { %1341 = vmatpush1.bf16.msra.mxu0 %v3272_v14  ;;  %3195 = vmatpush1.bf16.msra.mxu1 %v3272_v14  ;;  %v3355_v14 = vld [vmem:[%s3606_s24 + $0xe0] ss:$12 sps:$4 sm:$0xff]  }
  0x3d   : > { %1342 = vmatprep.subr.bf16.mxu0 %v3493_v1  ;;  %3180 = vmatprep.subr.bf16.mxu1 %v3493_v1 }
  0x40   : > { %1343 = vmatpush1.bf16.msra.mxu0 %v3273_v15  ;;  %3196 = vmatpush1.bf16.msra.mxu1 %v3273_v15  ;;  %v3356_v15 = vld [vmem:[%s3606_s24 + $0x13c] ss:$12 sps:$4 sm:$0xff]  }
  0x41   : > { %1344 = vmatprep.subr.bf16.mxu0 %v3493_v1  ;;  %3181 = vmatprep.subr.bf16.mxu1 %v3493_v1 }
  0x44   : > { %1345 = vmatpush1.bf16.msra.mxu0 %v3274_v16  ;;  %3197 = vmatpush1.bf16.msra.mxu1 %v3274_v16  ;;  %v3358_v16 = vld [vmem:[%s3606_s24 + $0xf8] ss:$12 sps:$4 sm:$0xff]  }
  0x45   : > { %1346 = vmatprep.subr.bf16.mxu0 %v3493_v1  ;;  %3182 = vmatprep.subr.bf16.mxu1 %v3493_v1 }
  0x48   : > { %1347 = vmatpush1.bf16.msra.mxu0 %v3275_v17  ;;  %3198 = vmatpush1.bf16.msra.mxu1 %v3275_v17  ;;  %v3359_v17 = vld [vmem:[%s3606_s24 + $0x138] ss:$12 sps:$4 sm:$0xff]  }
  0x49   : > { %1348 = vmatprep.subr.bf16.mxu0 %v3493_v1  ;;  %3183 = vmatprep.subr.bf16.mxu1 %v3493_v1  ;;  %v3339_v1 = vld [vmem:[%s3606_s24 + $0xd8] ss:$12 sps:$4 sm:$0xff]  }
  0x4c   : > { %1349 = vmatpush1.bf16.msra.mxu0 %v3276_v18  ;;  %3199 = vmatpush1.bf16.msra.mxu1 %v3276_v18  ;;  %v3360_v18 = vld [vmem:[%s3606_s24 + $0x110] ss:$12 sps:$4 sm:$0xff]  }
  0x4d   : > { %3092 = vmatprep.subr.bf16.mxu1 %v3283_v19 }
  0x4f   : > { %1351 = vmatmul.mubr.bf16.vlgmr.msra.gmra.mrb[0].mxu0 %v3277_v20  ;;  %1543 = vmatmul.mubr.bf16.vlgmr.msra.gmra.mrb[0].mxu1 %v3280_v21  ;;  %v3363_v20 = vld [vmem:[%s3606_s24 + $0x128] ss:$12 sps:$4 sm:$0xff]   ;;  %v3364_v21 = vld [vmem:[%s3606_s24 + $0x150] ss:$12 sps:$4 sm:$0xff]  }
  0x50   : > { %3093 = vmatpush3.bf16.msra.mxu1 %v3283_v19  ;;  %1358 = vmatprep.mubr.bf16.mxu0 %v3284_v22  ;;  %v3361_v19 = vld [vmem:[%s3606_s24 + $0x154] ss:$12 sps:$4 sm:$0xff]  }
  0x51   : > { %1550 = vmatprep.mubr.bf16.mxu1 %v3286_v23  ;;  %3094 = vmatprep.subr.bf16.mxu1 %v3290_v24  ;;  %v3365_v22 = vld [vmem:[%s3606_s24 + $0x140] ss:$12 sps:$4 sm:$0xff]  }
  0x52   : > { %v3366_v23 = vld [vmem:[%s3606_s24 + $0x16c] ss:$12 sps:$4 sm:$0xff]  }
  0x54   : > { %3095 = vmatpush3.bf16.msra.mxu1 %v3290_v24  ;;  %v3368_v24 = vld [vmem:[%s3606_s24 + $0x158] ss:$12 sps:$4 sm:$0xff]  }
  0x55   : > { %3096 = vmatprep.subr.bf16.mxu1 %v3297_v25 }
  0x57   : > { %1359 = vmatmul.mubr.bf16.gmra.mrb[4].mxu0 %v3288_v26  ;;  %1551 = vmatmul.mubr.bf16.gmra.mrb[4].mxu1 %v3289_v27  ;;  %v3370_v26 = vld [vmem:[%s3606_s24 + $0x170] ss:$12 sps:$4 sm:$0xff]  }
  0x58   : > { %1366 = vmatprep.mubr.bf16.mxu0 %v3291_v28  ;;  %1558 = vmatprep.mubr.bf16.mxu1 %v3293_v29  ;;  %v3371_v27 = vld [vmem:[%s3606_s24 + $0x184] ss:$12 sps:$4 sm:$0xff]   ;;  %v3373_v28 = vld [vmem:[%s3606_s24 + $0x188] ss:$12 sps:$4 sm:$0xff]   ;;  %v3374_v29 = vld [vmem:[%s3606_s24 + $0x180] ss:$12 sps:$4 sm:$0xff]  }
  0x59   : > { %3097 = vmatpush3.bf16.msra.mxu1 %v3297_v25  ;;  %v3369_v25 = vld [vmem:[%s3606_s24 + $0x168] ss:$12 sps:$4 sm:$0xff]  }
  0x5a   : > { %3098 = vmatprep.subr.bf16.mxu1 %v3310_v30 }
  0x5d   : > { %3099 = vmatpush3.bf16.msra.mxu1 %v3310_v30  ;;  %v3375_v30 = vld [vmem:[%s3606_s24 + $0x1a0] ss:$12 sps:$4 sm:$0xff]  }
  0x5e   : > { %3100 = vmatprep.subr.bf16.mxu1 %v3317_v34 }
  0x5f   : > { %1367 = vmatmul.mubr.bf16.gmra.mrb[8].mxu0 %v3295_v33  ;;  %1559 = vmatmul.mubr.bf16.gmra.mrb[8].mxu1 %v3296_v37  ;;  %v3379_v33 = vld [vmem:[%s3606_s24 + $0x198] ss:$12 sps:$4 sm:$0xff]   ;;  %v3779_v37 = vld [vmem:[%s3606_s24 + $0x1b0] ss:$12 sps:$4 sm:$0xff]  }
  0x60   : > { %1374 = vmatprep.mubr.bf16.mxu0 %v3298_v38  ;;  %1566 = vmatprep.mubr.bf16.mxu1 %v3300_v39  ;;  %v3782_v38 = vld [vmem:[%s3606_s24 + $0x200] ss:$12 sps:$4 sm:$0xff]  }
  0x61   : > { %3101 = vmatpush3.bf16.msra.mxu1 %v3317_v34  ;;  %v3380_v34 = vld [vmem:[%s3606_s24 + $0x1d0] ss:$12 sps:$4 sm:$0xff]   ;;  %v3785_v39 = vld [vmem:[%s3606_s24 + $0x1cc] ss:$12 sps:$4 sm:$0xff]  }
  0x62   : > { %3102 = vmatprep.subr.bf16.mxu1 %v1316_v40 }
  0x65   : > { %3103 = vmatpush3.bf16.msra.mxu1 %v1316_v40  ;;  %v3788_v40 = vld [vmem:[%s3606_s24 + $0x218] ss:$12 sps:$4 sm:$0xff]  }
  0x67   : > { %1375 = vmatmul.mubr.bf16.gmra.mrb[12].mxu0 %v3302_v41  ;;  %1567 = vmatmul.mubr.bf16.gmra.mrb[12].mxu1 %v3303_v42  ;;  %v3495_v41 = vmov 0.0   ;;  %v3389_v42 = vld [vmem:[%s3606_s24 + $0x1c8] ss:$12 sps:$4 sm:$0xff]  }
  0x68   : > { %1382 = vmatprep.mubr.bf16.mxu0 %v3304_v43  ;;  %1574 = vmatprep.mubr.bf16.mxu1 %v3306_v44  ;;  %308 = vst.msk [vmem:[#allocation2 + $0x10] sm:$0xff] %vm305_vm3, %v3495_v41  ;;  %306 = vst.msk [vmem:[#allocation2] sm:$0xff] %vm305_vm3, %v3495_v41  ;;  %v3390_v43 = vld [vmem:[%s3606_s24 + $0x230] ss:$12 sps:$4 sm:$0xff]  }
  0x69   : > { %307 = vst.msk [vmem:[#allocation2 + $0x8] sm:$0xff] %vm305_vm3, %v3495_v41  ;;  %309 = vst.msk [vmem:[#allocation2 + $0x18] sm:$0xff] %vm305_vm3, %v3495_v41  ;;  %v3391_v44 = vld [vmem:[%s3606_s24 + $0x1e4] ss:$12 sps:$4 sm:$0xff]  }
  0x6a   : > { %310 = vst.msk [vmem:[#allocation2 + $0x20] sm:$0xff] %vm305_vm3, %v3495_v41  ;;  %311 = vst.msk [vmem:[#allocation2 + $0x28] sm:$0xff] %vm305_vm3, %v3495_v41 }
  0x6b   : > { %312 = vst.msk [vmem:[#allocation2 + $0x30] sm:$0xff] %vm305_vm3, %v3495_v41  ;;  %313 = vst.msk [vmem:[#allocation2 + $0x38] sm:$0xff] %vm305_vm3, %v3495_v41 }
  0x6c   : > { %314 = vst.msk [vmem:[#allocation2 + $0x40] sm:$0xff] %vm305_vm3, %v3495_v41  ;;  %315 = vst.msk [vmem:[#allocation2 + $0x48] sm:$0xff] %vm305_vm3, %v3495_v41 }
  0x6d   : > { %316 = vst.msk [vmem:[#allocation2 + $0x50] sm:$0xff] %vm305_vm3, %v3495_v41  ;;  %317 = vst.msk [vmem:[#allocation2 + $0x58] sm:$0xff] %vm305_vm3, %v3495_v41 }
  0x6e   : > { %318 = vst.msk [vmem:[#allocation2 + $0x60] sm:$0xff] %vm305_vm3, %v3495_v41  ;;  %319 = vst.msk [vmem:[#allocation2 + $0x68] sm:$0xff] %vm305_vm3, %v3495_v41 }
  0x6f   : > { %1383 = vmatmul.mubr.bf16.gmra.mrb[16].mxu0 %v3308_v45  ;;  %1575 = vmatmul.mubr.bf16.gmra.mrb[16].mxu1 %v3309_v46  ;;  %320 = vst.msk [vmem:[#allocation2 + $0x70] sm:$0xff] %vm305_vm3, %v3495_v41  ;;  %321 = vst.msk [vmem:[#allocation2 + $0x78] sm:$0xff] %vm305_vm3, %v3495_v41  ;;  %v3393_v45 = vld [vmem:[%s3606_s24 + $0x248] ss:$12 sps:$4 sm:$0xff]   ;;  %v3394_v46 = vld [vmem:[%s3606_s24 + $0x1e0] ss:$12 sps:$4 sm:$0xff]  }
  0x70   : > { %1390 = vmatprep.mubr.bf16.mxu0 %v3311_v47  ;;  %1582 = vmatprep.mubr.bf16.mxu1 %v3313_v48  ;;  %322 = vst.msk [vmem:[#allocation2 + $0x80] sm:$0xff] %vm305_vm3, %v3495_v41  ;;  %323 = vst.msk [vmem:[#allocation2 + $0x88] sm:$0xff] %vm305_vm3, %v3495_v41  ;;  %v3395_v47 = vld [vmem:[%s3606_s24 + $0x260] ss:$12 sps:$4 sm:$0xff]   ;;  %v3396_v48 = vld [vmem:[%s3606_s24 + $0x1fc] ss:$12 sps:$4 sm:$0xff]  }
  0x71   : > { %324 = vst.msk [vmem:[#allocation2 + $0x90] sm:$0xff] %vm305_vm3, %v3495_v41  ;;  %325 = vst.msk [vmem:[#allocation2 + $0x98] sm:$0xff] %vm305_vm3, %v3495_v41 }
  0x72   : > { %326 = vst.msk [vmem:[#allocation2 + $0xa0] sm:$0xff] %vm305_vm3, %v3495_v41  ;;  %327 = vst.msk [vmem:[#allocation2 + $0xa8] sm:$0xff] %vm305_vm3, %v3495_v41 }
  0x73   : > { %328 = vst.msk [vmem:[#allocation2 + $0xb0] sm:$0xff] %vm305_vm3, %v3495_v41  ;;  %329 = vst.msk [vmem:[#allocation2 + $0xb8] sm:$0xff] %vm305_vm3, %v3495_v41 }
  0x74   : > { %330 = vst.msk [vmem:[#allocation2 + $0xc0] sm:$0xff] %vm305_vm3, %v3495_v41  ;;  %331 = vst.msk [vmem:[#allocation2 + $0xc8] sm:$0xff] %vm305_vm3, %v3495_v41 }
  0x75   : > { %332 = vst.msk [vmem:[#allocation2 + $0xd0] sm:$0xff] %vm305_vm3, %v3495_v41  ;;  %333 = vst.msk [vmem:[#allocation2 + $0xd8] sm:$0xff] %vm305_vm3, %v3495_v41 }
  0x76   : > { %334 = vst.msk [vmem:[#allocation2 + $0xe0] sm:$0xff] %vm305_vm3, %v3495_v41  ;;  %335 = vst.msk [vmem:[#allocation2 + $0xe8] sm:$0xff] %vm305_vm3, %v3495_v41 }
  0x77   : > { %1391 = vmatmul.mubr.bf16.gmra.mrb[20].mxu0 %v3315_v49  ;;  %1583 = vmatmul.mubr.bf16.gmra.mrb[20].mxu1 %v3316_v50  ;;  %336 = vst.msk [vmem:[#allocation2 + $0xf0] sm:$0xff] %vm305_vm3, %v3495_v41  ;;  %337 = vst.msk [vmem:[#allocation2 + $0xf8] sm:$0xff] %vm305_vm3, %v3495_v41  ;;  %v3398_v49 = vld [vmem:[%s3606_s24 + $0x278] ss:$12 sps:$4 sm:$0xff]  }
  0x78   : > { %1398 = vmatprep.mubr.bf16.mxu0 %v3318_v51  ;;  %1590 = vmatprep.mubr.bf16.mxu1 %v3320_v52  ;;  %338 = vst.msk [vmem:[#allocation2 + $0x100] sm:$0xff] %vm305_vm3, %v3495_v41  ;;  %339 = vst.msk [vmem:[#allocation2 + $0x108] sm:$0xff] %vm305_vm3, %v3495_v41  ;;  %v3399_v50 = vld [vmem:[%s3606_s24 + $0x1f8] ss:$12 sps:$4 sm:$0xff]   ;;  %v3400_v51 = vld [vmem:[%s3606_s24 + $0x290] ss:$12 sps:$4 sm:$0xff]  }
  0x79   : > { %340 = vst.msk [vmem:[#allocation2 + $0x110] sm:$0xff] %vm305_vm3, %v3495_v41  ;;  %341 = vst.msk [vmem:[#allocation2 + $0x118] sm:$0xff] %vm305_vm3, %v3495_v41  ;;  %v3401_v52 = vld [vmem:[%s3606_s24 + $0x214] ss:$12 sps:$4 sm:$0xff]  }
  0x7a   : > { %342 = vst.msk [vmem:[#allocation2 + $0x120] sm:$0xff] %vm305_vm3, %v3495_v41  ;;  %343 = vst.msk [vmem:[#allocation2 + $0x128] sm:$0xff] %vm305_vm3, %v3495_v41 }
  0x7b   : > { %344 = vst.msk [vmem:[#allocation2 + $0x130] sm:$0xff] %vm305_vm3, %v3495_v41  ;;  %345 = vst.msk [vmem:[#allocation2 + $0x138] sm:$0xff] %vm305_vm3, %v3495_v41 }
  0x7c   : > { %346 = vst.msk [vmem:[#allocation2 + $0x140] sm:$0xff] %vm305_vm3, %v3495_v41  ;;  %347 = vst.msk [vmem:[#allocation2 + $0x148] sm:$0xff] %vm305_vm3, %v3495_v41 }
  0x7d   : > { %348 = vst.msk [vmem:[#allocation2 + $0x150] sm:$0xff] %vm305_vm3, %v3495_v41  ;;  %349 = vst.msk [vmem:[#allocation2 + $0x158] sm:$0xff] %vm305_vm3, %v3495_v41 }
  0x7e   : > { %350 = vst.msk [vmem:[#allocation2 + $0x160] sm:$0xff] %vm305_vm3, %v3495_v41  ;;  %351 = vst.msk [vmem:[#allocation2 + $0x168] sm:$0xff] %vm305_vm3, %v3495_v41 }
  0x7f   : > { %1399 = vmatmul.mubr.bf16.gmra.mrb[24].mxu0 %v3322_v53  ;;  %1591 = vmatmul.mubr.bf16.gmra.mrb[24].mxu1 %v3323_v54  ;;  %352 = vst.msk [vmem:[#allocation2 + $0x170] sm:$0xff] %vm305_vm3, %v3495_v41  ;;  %353 = vst.msk [vmem:[#allocation2 + $0x178] sm:$0xff] %vm305_vm3, %v3495_v41  ;;  %v3403_v53 = vld [vmem:[%s3606_s24 + $0x2a8] ss:$12 sps:$4 sm:$0xff]   ;;  %v3404_v54 = vld [vmem:[%s3606_s24 + $0x210] ss:$12 sps:$4 sm:$0xff]  }
  0x80   : > { %1406 = vmatprep.mubr.bf16.mxu0 %v3325_v55  ;;  %1598 = vmatprep.mubr.bf16.mxu1 %v3327_v56  ;;  %354 = vst.msk [vmem:[#allocation2 + $0x180] sm:$0xff] %vm305_vm3, %v3495_v41  ;;  %355 = vst.msk [vmem:[#allocation2 + $0x188] sm:$0xff] %vm305_vm3, %v3495_v41  ;;  %v3405_v55 = vld [vmem:[%s3606_s24 + $0x2c0] ss:$12 sps:$4 sm:$0xff]  }
  0x81   : > { %356 = vst.msk [vmem:[#allocation2 + $0x190] sm:$0xff] %vm305_vm3, %v3495_v41  ;;  %357 = vst.msk [vmem:[#allocation2 + $0x198] sm:$0xff] %vm305_vm3, %v3495_v41  ;;  %v3406_v56 = vld [vmem:[%s3606_s24 + $0x22c] ss:$12 sps:$4 sm:$0xff]  }
  0x82   : > { %358 = vst.msk [vmem:[#allocation2 + $0x1a0] sm:$0xff] %vm305_vm3, %v3495_v41  ;;  %359 = vst.msk [vmem:[#allocation2 + $0x1a8] sm:$0xff] %vm305_vm3, %v3495_v41 }
  0x83   : > { %360 = vst.msk [vmem:[#allocation2 + $0x1b0] sm:$0xff] %vm305_vm3, %v3495_v41  ;;  %361 = vst.msk [vmem:[#allocation2 + $0x1b8] sm:$0xff] %vm305_vm3, %v3495_v41 }
  0x84   : > { %362 = vst.msk [vmem:[#allocation2 + $0x1c0] sm:$0xff] %vm305_vm3, %v3495_v41  ;;  %363 = vst.msk [vmem:[#allocation2 + $0x1c8] sm:$0xff] %vm305_vm3, %v3495_v41 }
  0x85   : > { %364 = vst.msk [vmem:[#allocation2 + $0x1d0] sm:$0xff] %vm305_vm3, %v3495_v41  ;;  %365 = vst.msk [vmem:[#allocation2 + $0x1d8] sm:$0xff] %vm305_vm3, %v3495_v41 }
  0x86   : > { %366 = vst.msk [vmem:[#allocation2 + $0x1e0] sm:$0xff] %vm305_vm3, %v3495_v41  ;;  %367 = vst.msk [vmem:[#allocation2 + $0x1e8] sm:$0xff] %vm305_vm3, %v3495_v41 }
  0x87   : > { %1407 = vmatmul.mubr.bf16.gmra.mrb[28].mxu0 %v3329_v57  ;;  %1599 = vmatmul.mubr.bf16.gmra.mrb[28].mxu1 %v3330_v58  ;;  %368 = vst.msk [vmem:[#allocation2 + $0x1f0] sm:$0xff] %vm305_vm3, %v3495_v41  ;;  %369 = vst.msk [vmem:[#allocation2 + $0x1f8] sm:$0xff] %vm305_vm3, %v3495_v41  ;;  %v3408_v57 = vld [vmem:[%s3606_s24 + $0x2d8] ss:$12 sps:$4 sm:$0xff]   ;;  %v3409_v58 = vld [vmem:[%s3606_s24 + $0x228] ss:$12 sps:$4 sm:$0xff]  }
  0x88   : > { %1414 = vmatprep.mubr.bf16.mxu0 %v3331_v59  ;;  %3104 = vmatprep.mubr.msk.bf16.mxu1 %vm1214_vm2, %v3333_v60  ;;  %v3410_v59 = vld [vmem:[%s3606_s24 + $0x2f0] ss:$12 sps:$4 sm:$0xff]   ;;  %s3413_s24 = scalar_lea.vmem %s4448_s26, 4096 }
  0x89   : > { %p3414_p12 = scmp.ne.s32.totalorder %s4448_s26, %s3413_s24  ;;  %p3421_p2 = scmp.lt.s32.totalorder %s3419_s9, %s3413_s24 }
  0x8b   : > { %p3415_p13 = pnand %p3414_p12, %p3564_p4  ;;  %p3422_p3 = por %p3421_p2, %p3420_p1 }
  0x8d   : > { %p3416_p0 = pneg %p3415_p13 }
  0x8f   : > { %1415 = vmatmul.mubr.bf16.gmra.mrb[32].mxu0 %v3334_v61  ;;  %3105 = vmatmul.mubr.msk.bf16.vlgmr.msra.gmra.mrb[32].mxu1 %vm1214_vm2, %v3335_v62  ;;  %p3423_p5 = pnand %p3422_p3, %p3416_p0 }
  0x90   : > { %1422 = vmatprep.mubr.bf16.mxu0 %v3336_v63  ;;  %3108 = vmatprep.mubr.msk.bf16.mxu1 %vm1214_vm2, %v3338_v0 }
  0x97   : > { %1423 = vmatmul.mubr.bf16.gmra.mrb[36].mxu0 %v3339_v1  ;;  %3109 = vmatmul.mubr.msk.bf16.gmra.mrb[36].mxu1 %vm1214_vm2, %v3340_v2 }
  0x98   : > { %1430 = vmatprep.mubr.bf16.mxu0 %v3341_v3  ;;  %3112 = vmatprep.mubr.msk.bf16.mxu1 %vm1214_vm2, %v3343_v4 }
  0x9f   : > { %1431 = vmatmul.mubr.bf16.gmra.mrb[40].mxu0 %v3344_v5  ;;  %3113 = vmatmul.mubr.msk.bf16.gmra.mrb[40].mxu1 %vm1214_vm2, %v3345_v6 }
  0xa0   : > { %1438 = vmatprep.mubr.bf16.mxu0 %v3346_v7  ;;  %3116 = vmatprep.mubr.msk.bf16.mxu1 %vm1214_vm2, %v3348_v8 }
  0xa7   : > { %1439 = vmatmul.mubr.bf16.gmra.mrb[44].mxu0 %v3349_v9  ;;  %3117 = vmatmul.mubr.msk.bf16.gmra.mrb[44].mxu1 %vm1214_vm2, %v3350_v10 }
  0xa8   : > { %1446 = vmatprep.mubr.bf16.mxu0 %v3351_v11  ;;  %3120 = vmatprep.mubr.msk.bf16.mxu1 %vm1214_vm2, %v3353_v12 }
  0xaf   : > { %1447 = vmatmul.mubr.bf16.gmra.mrb[48].mxu0 %v3354_v13  ;;  %3121 = vmatmul.mubr.msk.bf16.gmra.mrb[48].mxu1 %vm1214_vm2, %v3355_v14 }
  0xb0   : > { %1454 = vmatprep.mubr.bf16.mxu0 %v3356_v15  ;;  %3124 = vmatprep.mubr.msk.bf16.mxu1 %vm1214_vm2, %v3358_v16 }
  0xb7   : > { %1455 = vmatmul.mubr.bf16.gmra.mrb[52].mxu0 %v3359_v17  ;;  %3125 = vmatmul.mubr.msk.bf16.gmra.mrb[52].mxu1 %vm1214_vm2, %v3360_v18 }
  0xb8   : > { %1462 = vmatprep.mubr.bf16.mxu0 %v3361_v19  ;;  %3128 = vmatprep.mubr.msk.bf16.mxu1 %vm1214_vm2, %v3363_v20 }
  0xbf   : > { %1463 = vmatmul.mubr.bf16.gmra.mrb[56].mxu0 %v3364_v21  ;;  %3129 = vmatmul.mubr.msk.bf16.gmra.mrb[56].mxu1 %vm1214_vm2, %v3365_v22 }
  0xc0   : > { %1470 = vmatprep.mubr.bf16.mxu0 %v3366_v23  ;;  %3132 = vmatprep.mubr.msk.bf16.mxu1 %vm1214_vm2, %v3368_v24 }
  0xc7   : > { %1471 = vmatmul.mubr.bf16.gmra.mrb[60].mxu0 %v3369_v25  ;;  %3133 = vmatmul.mubr.msk.bf16.gmra.mrb[60].mxu1 %vm1214_vm2, %v3370_v26 }
  0xc8   : > { %1478 = vmatprep.mubr.bf16.mxu0 %v3371_v27  ;;  %3136 = vmatprep.mubr.msk.bf16.mxu1 %vm1214_vm2, %v3373_v28 }
  0xcf   : > { %1479 = vmatmul.mubr.bf16.gmra.mrb[64].mxu0 %v3374_v29  ;;  %3137 = vmatmul.mubr.msk.bf16.gmra.mrb[64].mxu1 %vm1214_vm2, %v3375_v30 }
  0xd0   : > { %1486 = vmatprep.mubr.bf16.mxu0 %v3376_v31  ;;  %3140 = vmatprep.mubr.msk.bf16.mxu1 %vm1214_vm2, %v3378_v32 }
  0xd7   : > { %1487 = vmatmul.mubr.bf16.gmra.mrb[68].mxu0 %v3379_v33  ;;  %3141 = vmatmul.mubr.msk.bf16.gmra.mrb[68].mxu1 %vm1214_vm2, %v3380_v34 }
  0xd8   : > { %1494 = vmatprep.mubr.bf16.mxu0 %v3381_v35  ;;  %3144 = vmatprep.mubr.msk.bf16.mxu1 %vm1214_vm2, %v3383_v36 }
  0xdf   : > { %1495 = vmatmul.mubr.bf16.gmra.mrb[72].mxu0 %v3779_v37  ;;  %3145 = vmatmul.mubr.msk.bf16.gmra.mrb[72].mxu1 %vm1214_vm2, %v3782_v38 }
  0xe0   : > { %1502 = vmatprep.mubr.bf16.mxu0 %v3785_v39  ;;  %3148 = vmatprep.mubr.msk.bf16.mxu1 %vm1214_vm2, %v3788_v40 }
  0xe7   : > { %1503 = vmatmul.mubr.bf16.gmra.mrb[76].mxu0 %v3389_v42  ;;  %3149 = vmatmul.mubr.msk.bf16.gmra.mrb[76].mxu1 %vm1214_vm2, %v3390_v43 }
  0xe8   : > { %1510 = vmatprep.mubr.bf16.mxu0 %v3391_v44  ;;  %3152 = vmatprep.mubr.msk.bf16.mxu1 %vm1214_vm2, %v3393_v45 }
  0xef   : > { %1511 = vmatmul.mubr.bf16.gmra.mrb[80].mxu0 %v3394_v46  ;;  %3153 = vmatmul.mubr.msk.bf16.gmra.mrb[80].mxu1 %vm1214_vm2, %v3395_v47 }
  0xf0   : > { %1518 = vmatprep.mubr.bf16.mxu0 %v3396_v48  ;;  %3156 = vmatprep.mubr.msk.bf16.mxu1 %vm1214_vm2, %v3398_v49 }
  0xf7   : > { %1519 = vmatmul.mubr.bf16.gmra.mrb[84].mxu0 %v3399_v50  ;;  %3157 = vmatmul.mubr.msk.bf16.gmra.mrb[84].mxu1 %vm1214_vm2, %v3400_v51 }
  0xf8   : > { %1526 = vmatprep.mubr.bf16.mxu0 %v3401_v52  ;;  %3160 = vmatprep.mubr.msk.bf16.mxu1 %vm1214_vm2, %v3403_v53 }
  0xff   : > { %1527 = vmatmul.mubr.bf16.gmra.mrb[88].mxu0 %v3404_v54  ;;  %3161 = vmatmul.mubr.msk.bf16.gmra.mrb[88].mxu1 %vm1214_vm2, %v3405_v55 }
 0x100   : > { %1534 = vmatprep.mubr.bf16.mxu0 %v3406_v56  ;;  %3164 = vmatprep.mubr.msk.bf16.mxu1 %vm1214_vm2, %v3408_v57 }
 0x107   : > { %1535 = vmatmul.mubr.bf16.gmra.mrb[92].mxu0 %v3409_v58  ;;  %3165 = vmatmul.mubr.msk.bf16.gmra.mrb[92].mxu1 %vm1214_vm2, %v3410_v59 }
 0x122   : > { %v3951_v60 = vpop.f32.mrb[0].mxu0  ;;  %v3953_v61 = vpop.f32.mrb[0].mxu1 }
 0x123   : > { %v1354_v62 = vpop.f32.mrb[1].mxu0  ;;  %v1546_v63 = vpop.f32.mrb[1].mxu1 }
 0x124   : > { %v3955_v0 = vpop.f32.mrb[2].mxu0  ;;  %v3957_v1 = vpop.f32.mrb[2].mxu1  ;;  %v372_v63 = vld [vmem:[#allocation2 + $0x10] sm:$0xff] }
 0x125   : > { %v1357_v2 = vpop.f32.mrb[3].mxu0  ;;  %v1549_v3 = vpop.f32.mrb[3].mxu1 }
 0x12a   : > { %v1360_v4 = vpop.f32.mrb[4].mxu0  ;;  %v3959_v5 = vpop.f32.mrb[4].mxu1 }
 0x12b   : > { %v1362_v6 = vpop.f32.mrb[5].mxu0  ;;  %v1554_v7 = vpop.f32.mrb[5].mxu1 }
 0x12c   : > { %v3961_v8 = vpop.f32.mrb[6].mxu0  ;;  %v3963_v9 = vpop.f32.mrb[6].mxu1  ;;  %v370_v7 = vld [vmem:[#allocation2] sm:$0xff] }
 0x12d   : > { %v1365_v10 = vpop.f32.mrb[7].mxu0  ;;  %v1557_v11 = vpop.f32.mrb[7].mxu1 }
 0x132   : > { %v3965_v12 = vpop.f32.mrb[8].mxu0  ;;  %v3967_v13 = vpop.f32.mrb[8].mxu1 }
 0x133   : > { %v1370_v14 = vpop.f32.mrb[9].mxu0  ;;  %v1562_v15 = vpop.f32.mrb[9].mxu1 }
 0x134   : > { %v3969_v16 = vpop.f32.mrb[10].mxu0  ;;  %v3971_v17 = vpop.f32.mrb[10].mxu1  ;;  %v373_v15 = vld [vmem:[#allocation2 + $0x18] sm:$0xff] }
 0x135   : > { %v1373_v18 = vpop.f32.mrb[11].mxu0  ;;  %v1565_v19 = vpop.f32.mrb[11].mxu1 }
 0x13a   : > { %v3973_v20 = vpop.f32.mrb[12].mxu0  ;;  %v3975_v21 = vpop.f32.mrb[12].mxu1 }
 0x13b   : > { %v1378_v22 = vpop.f32.mrb[13].mxu0  ;;  %v1570_v23 = vpop.f32.mrb[13].mxu1 }
 0x13c   : > { %v3977_v24 = vpop.f32.mrb[14].mxu0  ;;  %v3979_v25 = vpop.f32.mrb[14].mxu1 }
 0x13d   : > { %v1381_v26 = vpop.f32.mrb[15].mxu0  ;;  %v1573_v27 = vpop.f32.mrb[15].mxu1 }
 0x13e   : > { %v371_v26 = vld [vmem:[#allocation2 + $0x8] sm:$0xff] }
 0x142   : > { %v3981_v28 = vpop.f32.mrb[16].mxu0  ;;  %v3983_v29 = vpop.f32.mrb[16].mxu1 }
 0x143   : > { %v1386_v30 = vpop.f32.mrb[17].mxu0  ;;  %v1578_v31 = vpop.f32.mrb[17].mxu1 }
 0x144   : > { %v3985_v32 = vpop.f32.mrb[18].mxu0  ;;  %v3987_v33 = vpop.f32.mrb[18].mxu1 }
 0x145   : > { %v1389_v34 = vpop.f32.mrb[19].mxu0  ;;  %v1581_v35 = vpop.f32.mrb[19].mxu1 }
 0x146   : > { %v376_v35 = vld [vmem:[#allocation2 + $0x30] sm:$0xff] }
 0x14a   : > { %v3989_v36 = vpop.f32.mrb[20].mxu0  ;;  %v3991_v37 = vpop.f32.mrb[20].mxu1 }
 0x14b   : > { %v1394_v38 = vpop.f32.mrb[21].mxu0  ;;  %v1586_v39 = vpop.f32.mrb[21].mxu1 }
 0x14c   : > { %v3993_v40 = vpop.f32.mrb[22].mxu0  ;;  %v3995_v41 = vpop.f32.mrb[22].mxu1 }
 0x14d   : > { %v1397_v42 = vpop.f32.mrb[23].mxu0  ;;  %v1589_v43 = vpop.f32.mrb[23].mxu1 }
 0x14e   : > { %v374_v42 = vld [vmem:[#allocation2 + $0x20] sm:$0xff] }
 0x14f   : > { %v4030_v43 = vld [vmem:[%s4508_s2] ss:$0 sm:$0xff] }
 0x152   : > { %v3997_v44 = vpop.f32.mrb[24].mxu0  ;;  %v3999_v45 = vpop.f32.mrb[24].mxu1 }
 0x153   : > { %v1402_v46 = vpop.f32.mrb[25].mxu0  ;;  %v1594_v47 = vpop.f32.mrb[25].mxu1 }
 0x154   : > { %v4001_v48 = vpop.f32.mrb[26].mxu0  ;;  %v4003_v49 = vpop.f32.mrb[26].mxu1 }
 0x155   : > { %v1405_v50 = vpop.f32.mrb[27].mxu0  ;;  %v1597_v51 = vpop.f32.mrb[27].mxu1 }
 0x156   : > { %v377_v50 = vld [vmem:[#allocation2 + $0x38] sm:$0xff] }
 0x15a   : > { %v4005_v52 = vpop.f32.mrb[28].mxu0  ;;  %v4007_v53 = vpop.f32.mrb[28].mxu1 }
 0x15b   : > { %v1410_v54 = vpop.f32.mrb[29].mxu0  ;;  %v1602_v55 = vpop.f32.mrb[29].mxu1 }
 0x15c   : > { %v4009_v56 = vpop.f32.mrb[30].mxu0  ;;  %v4011_v57 = vpop.f32.mrb[30].mxu1 }
 0x15d   : > { %v1413_v58 = vpop.f32.mrb[31].mxu0  ;;  %v1605_v59 = vpop.f32.mrb[31].mxu1 }
 0x162   : > { %v4013_v62 = vpop.f32.mrb[32].mxu0  ;;  %v3106_v2 = vpop.f32.mrb[32].mxu1 }
 0x163   : > { %v1650_v3 = vadd.f32 %v3106_v2, %v1360_v4  ;;  %v1418_v6 = vpop.f32.mrb[33].mxu0  ;;  %v1641_v10 = vpop.f32.mrb[33].mxu1  ;;  %v4040_v2 = vld [vmem:[%s4509_s3] ss:$0 sm:$0xff] }
 0x164   : > { %v1642_v11 = vadd.f32 %v1641_v10, %v3951_v60  ;;  %v4016_v14 = vpop.f32.mrb[34].mxu0  ;;  %v3107_v18 = vpop.f32.mrb[34].mxu1 }
 0x165   : > { %v1898_v19 = vadd.f32 %v1650_v3, %v372_v63  ;;  %v1653_v22 = vadd.f32 %v3107_v18, %v3961_v8  ;;  %v1421_v23 = vpop.f32.mrb[35].mxu0  ;;  %v1644_v27 = vpop.f32.mrb[35].mxu1 }
 0x166   : > { %v1896_v30 = vadd.f32 %v1642_v11, %v370_v7  ;;  %v1645_v31 = vadd.f32 %v1644_v27, %v3955_v0  ;;  %v380_v27 = vld [vmem:[#allocation2 + $0x50] sm:$0xff] }
 0x167   : > { %1963 = vst.msk [vmem:[#allocation2 + $0x10] sm:$0xff] %vm305_vm3, %v1898_v19  ;;  %v1899_v4 = vadd.f32 %v1653_v22, %v373_v15 }
 0x168   : > { %1961 = vst.msk [vmem:[#allocation2] sm:$0xff] %vm305_vm3, %v1896_v30  ;;  %v1897_v34 = vadd.f32 %v1645_v31, %v371_v26 }
 0x169   : > { %1964 = vst.msk [vmem:[#allocation2 + $0x18] sm:$0xff] %vm305_vm3, %v1899_v4 }
 0x16a   : > { %1962 = vst.msk [vmem:[#allocation2 + $0x8] sm:$0xff] %vm305_vm3, %v1897_v34  ;;  %v4024_v60 = vpop.f32.mrb[36].mxu0  ;;  %v3110_v8 = vpop.f32.mrb[36].mxu1 }
 0x16b   : > { %v1666_v38 = vadd.f32 %v3110_v8, %v3973_v20  ;;  %v1426_v39 = vpop.f32.mrb[37].mxu0  ;;  %v1657_v0 = vpop.f32.mrb[37].mxu1  ;;  %v375_v20 = vld [vmem:[#allocation2 + $0x28] sm:$0xff]  ;;  %v378_v8 = vld [vmem:[#allocation2 + $0x40] sm:$0xff] }
 0x16c   : > { %v1658_v46 = vadd.f32 %v1657_v0, %v3965_v12  ;;  %v4033_v47 = vpop.f32.mrb[38].mxu0  ;;  %v3111_v51 = vpop.f32.mrb[38].mxu1 }
 0x16d   : > { %v1902_v54 = vadd.f32 %v1666_v38, %v376_v35  ;;  %v1669_v55 = vadd.f32 %v3111_v51, %v3977_v24  ;;  %v1429_v58 = vpop.f32.mrb[39].mxu0  ;;  %v1660_v59 = vpop.f32.mrb[39].mxu1 }
 0x16e   : > { %v2030_v63 = vld [vmem:[#allocation2 + $0x10] sm:$0xff]  ;;  %v1900_v3 = vadd.f32 %v1658_v46, %v374_v42  ;;  %v1661_v12 = vadd.f32 %v1660_v59, %v3969_v16  ;;  %v379_v59 = vld [vmem:[#allocation2 + $0x48] sm:$0xff] }
 0x16f   : > { %v2101_v6 = vmul.f32 %v4030_v43, %v2030_v63  ;;  %v2028_v7 = vld [vmem:[#allocation2] sm:$0xff]  ;;  %1967 = vst.msk [vmem:[#allocation2 + $0x30] sm:$0xff] %vm305_vm3, %v1902_v54  ;;  %v1903_v24 = vadd.f32 %v1669_v55, %v377_v50  ;;  %v381_v50 = vld [vmem:[#allocation2 + $0x58] sm:$0xff] }
 0x170   : > { %v2099_v10 = vmul.f32 %v4030_v43, %v2028_v7  ;;  %v2031_v11 = vld [vmem:[#allocation2 + $0x18] sm:$0xff]  ;;  %1965 = vst.msk [vmem:[#allocation2 + $0x20] sm:$0xff] %vm305_vm3, %v1900_v3  ;;  %v1901_v15 = vadd.f32 %v1661_v12, %v375_v20 }
 0x171   : > { %v2172_v18 = vadd.f32 %v4040_v2, %v2101_v6  ;;  %v2102_v19 = vmul.f32 %v4030_v43, %v2031_v11  ;;  %v2029_v16 = vld [vmem:[#allocation2 + $0x8] sm:$0xff]  ;;  %1968 = vst.msk [vmem:[#allocation2 + $0x38] sm:$0xff] %vm305_vm3, %v1903_v24 }
 0x172   : > { %v2170_v22 = vadd.f32 %v4040_v2, %v2099_v10  ;;  %v2100_v23 = vmul.f32 %v4030_v43, %v2029_v16  ;;  %1966 = vst.msk [vmem:[#allocation2 + $0x28] sm:$0xff] %vm305_vm3, %v1901_v15  ;;  %v4057_v26 = vpop.f32.mrb[40].mxu0  ;;  %v3114_v30 = vpop.f32.mrb[40].mxu1 }
 0x173   : > { %v2236_v31 = vmax.f32 %v2172_v18, 0.0  ;;  %v2173_v4 = vadd.f32 %v4040_v2, %v2102_v19  ;;  %v1682_v34 = vadd.f32 %v3114_v30, %v3989_v36  ;;  %v1434_v35 = vpop.f32.mrb[41].mxu0  ;;  %v1673_v38 = vpop.f32.mrb[41].mxu1 }
 0x174   : > { %v2234_v39 = vmax.f32 %v2170_v22, 0.0  ;;  %v2171_v42 = vadd.f32 %v4040_v2, %v2100_v23  ;;  %v1674_v0 = vadd.f32 %v1673_v38, %v3981_v28  ;;  %v4063_v46 = vpop.f32.mrb[42].mxu0  ;;  %v3115_v51 = vpop.f32.mrb[42].mxu1 }
 0x175   : > { %v2991_v54 = vpack.c.bf16 %v2236_v31, %v2236_v31  ;;  %v2237_v55 = vmax.f32 %v2173_v4, 0.0  ;;  %v1906_v58 = vadd.f32 %v1682_v34, %v380_v27  ;;  %v1685_v20 = vadd.f32 %v3115_v51, %v3993_v40  ;;  %v1437_v36 = vpop.f32.mrb[43].mxu0  ;;  %v1676_v63 = vpop.f32.mrb[43].mxu1  ;;  %v384_v4 = vld [vmem:[#allocation2 + $0x70] sm:$0xff] }
 0x176   : > { %v2989_v3 = vpack.c.bf16 %v2234_v39, %v2234_v39  ;;  %v2235_v12 = vmax.f32 %v2171_v42, 0.0  ;;  %v2034_v6 = vld [vmem:[#allocation2 + $0x30] sm:$0xff]  ;;  %v1904_v7 = vadd.f32 %v1674_v0, %v378_v8  ;;  %v1677_v24 = vadd.f32 %v1676_v63, %v3985_v32  ;;  %v382_v42 = vld [vmem:[#allocation2 + $0x60] sm:$0xff] }
 0x177   : > { %2557 = vst.msk [vmem:[%s4068_s11 + $0x8] sm:$0xf] %vm2554_vm4, %v2991_v54  ;;  %v2992_v28 = vpack.c.bf16 %v2237_v55, %v2237_v55  ;;  %v2105_v40 = vmul.f32 %v4030_v43, %v2034_v6  ;;  %v2032_v10 = vld [vmem:[#allocation2 + $0x20] sm:$0xff]  ;;  %v1907_v11 = vadd.f32 %v1685_v20, %v381_v50 }
 0x178   : > { %1971 = vst.msk [vmem:[#allocation2 + $0x50] sm:$0xff] %vm305_vm3, %v1906_v58  ;;  %v2990_v15 = vpack.c.bf16 %v2235_v12, %v2235_v12  ;;  %v2103_v32 = vmul.f32 %v4030_v43, %v2032_v10  ;;  %v2035_v18 = vld [vmem:[#allocation2 + $0x38] sm:$0xff]  ;;  %1969 = vst.msk [vmem:[#allocation2 + $0x40] sm:$0xff] %vm305_vm3, %v1904_v7  ;;  %v1905_v19 = vadd.f32 %v1677_v24, %v379_v59  ;;  %v383_v12 = vld [vmem:[#allocation2 + $0x68] sm:$0xff] }
 0x179   : > { %2555 = vst.msk [vmem:[%s4068_s11] sm:$0xf] %vm2554_vm4, %v2989_v3  ;;  %2558 = vst.msk [vmem:[%s4068_s11 + $0xc] sm:$0xf] %vm2554_vm4, %v2992_v28  ;;  %v2176_v16 = vadd.f32 %v4040_v2, %v2105_v40  ;;  %v2106_v22 = vmul.f32 %v4030_v43, %v2035_v18  ;;  %v2033_v23 = vld [vmem:[#allocation2 + $0x28] sm:$0xff]  ;;  %v385_v58 = vld [vmem:[#allocation2 + $0x78] sm:$0xff] }
 0x17a   : > { %1972 = vst.msk [vmem:[#allocation2 + $0x58] sm:$0xff] %vm305_vm3, %v1907_v11  ;;  %v2174_v27 = vadd.f32 %v4040_v2, %v2103_v32  ;;  %v2104_v30 = vmul.f32 %v4030_v43, %v2033_v23  ;;  %1970 = vst.msk [vmem:[#allocation2 + $0x48] sm:$0xff] %vm305_vm3, %v1905_v19  ;;  %v4088_v31 = vpop.f32.mrb[44].mxu0  ;;  %v3118_v34 = vpop.f32.mrb[44].mxu1 }
 0x17b   : > { %2556 = vst.msk [vmem:[%s4068_s11 + $0x4] sm:$0xf] %vm2554_vm4, %v2990_v15  ;;  %v2240_v35 = vmax.f32 %v2176_v16, 0.0  ;;  %v2177_v8 = vadd.f32 %v4040_v2, %v2106_v22  ;;  %v1698_v38 = vadd.f32 %v3118_v34, %v4005_v52  ;;  %v1442_v39 = vpop.f32.mrb[45].mxu0  ;;  %v1689_v0 = vpop.f32.mrb[45].mxu1  ;;  %v388_v34 = vld [vmem:[#allocation2 + $0x90] sm:$0xff] }
 0x17c   : > { %v2238_v50 = vmax.f32 %v2174_v27, 0.0  ;;  %v2175_v51 = vadd.f32 %v4040_v2, %v2104_v30  ;;  %v1690_v54 = vadd.f32 %v1689_v0, %v3997_v44  ;;  %v4094_v55 = vpop.f32.mrb[46].mxu0  ;;  %v3119_v20 = vpop.f32.mrb[46].mxu1  ;;  %v386_v0 = vld [vmem:[#allocation2 + $0x80] sm:$0xff] }
 0x17d   : > { %v2995_v36 = vpack.c.bf16 %v2240_v35, %v2240_v35  ;;  %v2241_v59 = vmax.f32 %v2177_v8, 0.0  ;;  %v1910_v63 = vadd.f32 %v1698_v38, %v384_v4  ;;  %v1701_v3 = vadd.f32 %v3119_v20, %v4009_v56  ;;  %v1445_v52 = vpop.f32.mrb[47].mxu0  ;;  %v1692_v6 = vpop.f32.mrb[47].mxu1 }
 0x17e   : > { %v2993_v7 = vpack.c.bf16 %v2238_v50, %v2238_v50  ;;  %v2239_v24 = vmax.f32 %v2175_v51, 0.0  ;;  %v1908_v40 = vadd.f32 %v1690_v54, %v382_v42  ;;  %v1693_v44 = vadd.f32 %v1692_v6, %v4001_v48  ;;  %v387_v6 = vld [vmem:[#allocation2 + $0x88] sm:$0xff] }
 0x17f   : > { %v2038_v28 = vld [vmem:[#allocation2 + $0x50] sm:$0xff]  ;;  %2561 = vst.msk [vmem:[%s4068_s11 + $0x18] sm:$0xf] %vm2554_vm4, %v2995_v36  ;;  %v2996_v10 = vpack.c.bf16 %v2241_v59, %v2241_v59  ;;  %v2036_v15 = vld [vmem:[#allocation2 + $0x40] sm:$0xff]  ;;  %v1911_v56 = vadd.f32 %v1701_v3, %v385_v58  ;;  %v389_v36 = vld [vmem:[#allocation2 + $0x98] sm:$0xff] }
 0x180   : > { %v2109_v11 = vmul.f32 %v4030_v43, %v2038_v28  ;;  %1975 = vst.msk [vmem:[#allocation2 + $0x70] sm:$0xff] %vm305_vm3, %v1910_v63  ;;  %v2994_v32 = vpack.c.bf16 %v2239_v24, %v2239_v24  ;;  %v2107_v18 = vmul.f32 %v4030_v43, %v2036_v15  ;;  %1973 = vst.msk [vmem:[#allocation2 + $0x60] sm:$0xff] %vm305_vm3, %v1908_v40 }
 0x181   : > { %2559 = vst.msk [vmem:[%s4068_s11 + $0x10] sm:$0xf] %vm2554_vm4, %v2993_v7  ;;  %v2039_v19 = vld [vmem:[#allocation2 + $0x58] sm:$0xff]  ;;  %v1909_v16 = vadd.f32 %v1693_v44, %v383_v12  ;;  %2562 = vst.msk [vmem:[%s4068_s11 + $0x1c] sm:$0xf] %vm2554_vm4, %v2996_v10  ;;  %v2037_v23 = vld [vmem:[#allocation2 + $0x48] sm:$0xff] }
 0x182   : > { %v2180_v48 = vadd.f32 %v4040_v2, %v2109_v11  ;;  %v2110_v22 = vmul.f32 %v4030_v43, %v2039_v19  ;;  %1976 = vst.msk [vmem:[#allocation2 + $0x78] sm:$0xff] %vm305_vm3, %v1911_v56  ;;  %v2178_v27 = vadd.f32 %v4040_v2, %v2107_v18  ;;  %v2108_v30 = vmul.f32 %v4030_v43, %v2037_v23  ;;  %v4116_v4 = vpop.f32.mrb[48].mxu0  ;;  %v3122_v35 = vpop.f32.mrb[48].mxu1 }
 0x183   : > { %2560 = vst.msk [vmem:[%s4068_s11 + $0x14] sm:$0xf] %vm2554_vm4, %v2994_v32  ;;  %v1714_v39 = vadd.f32 %v3122_v35, %v4024_v60  ;;  %v1450_v42 = vpop.f32.mrb[49].mxu0  ;;  %v1705_v50 = vpop.f32.mrb[49].mxu1 }
 0x184   : > { %1974 = vst.msk [vmem:[#allocation2 + $0x68] sm:$0xff] %vm305_vm3, %v1909_v16  ;;  %v2244_v8 = vmax.f32 %v2180_v48, 0.0  ;;  %v2181_v38 = vadd.f32 %v4040_v2, %v2110_v22  ;;  %v2242_v51 = vmax.f32 %v2178_v27, 0.0  ;;  %v2179_v54 = vadd.f32 %v4040_v2, %v2108_v30  ;;  %v4122_v20 = vpop.f32.mrb[50].mxu0  ;;  %v3123_v59 = vpop.f32.mrb[50].mxu1  ;;  %v392_v30 = vld [vmem:[#allocation2 + $0xb0] sm:$0xff] }
 0x185   : > { %v1706_v58 = vadd.f32 %v1705_v50, %v4013_v62  ;;  %v1914_v52 = vadd.f32 %v1714_v39, %v388_v34  ;;  %v1717_v12 = vadd.f32 %v3123_v59, %v4033_v47  ;;  %v1453_v60 = vpop.f32.mrb[51].mxu0  ;;  %v1708_v7 = vpop.f32.mrb[51].mxu1  ;;  %v390_v42 = vld [vmem:[#allocation2 + $0xa0] sm:$0xff] }
 0x186   : > { %v2999_v63 = vpack.c.bf16 %v2244_v8, %v2244_v8  ;;  %v2245_v3 = vmax.f32 %v2181_v38, 0.0  ;;  %v2997_v24 = vpack.c.bf16 %v2242_v51, %v2242_v51  ;;  %v2243_v28 = vmax.f32 %v2179_v54, 0.0 }
 0x187   : > { %v2042_v40 = vld [vmem:[#allocation2 + $0x70] sm:$0xff]  ;;  %v1912_v44 = vadd.f32 %v1706_v58, %v386_v0  ;;  %v1709_v62 = vadd.f32 %v1708_v7, %v4016_v14  ;;  %v2040_v15 = vld [vmem:[#allocation2 + $0x60] sm:$0xff]  ;;  %1979 = vst.msk [vmem:[#allocation2 + $0x90] sm:$0xff] %vm305_vm3, %v1914_v52  ;;  %v1915_v47 = vadd.f32 %v1717_v12, %v389_v36  ;;  %v393_v36 = vld [vmem:[#allocation2 + $0xb8] sm:$0xff] }
 0x188   : > { %2565 = vst.msk [vmem:[%s4068_s11 + $0x28] sm:$0xf] %vm2554_vm4, %v2999_v63  ;;  %v3000_v10 = vpack.c.bf16 %v2245_v3, %v2245_v3  ;;  %v2113_v11 = vmul.f32 %v4030_v43, %v2042_v40  ;;  %2563 = vst.msk [vmem:[%s4068_s11 + $0x20] sm:$0xf] %vm2554_vm4, %v2997_v24  ;;  %v2998_v56 = vpack.c.bf16 %v2243_v28, %v2243_v28 }
 0x189   : > { %v2111_v32 = vmul.f32 %v4030_v43, %v2040_v15  ;;  %v2043_v18 = vld [vmem:[#allocation2 + $0x78] sm:$0xff]  ;;  %1977 = vst.msk [vmem:[#allocation2 + $0x80] sm:$0xff] %vm305_vm3, %v1912_v44  ;;  %v1913_v19 = vadd.f32 %v1709_v62, %v387_v6  ;;  %1980 = vst.msk [vmem:[#allocation2 + $0x98] sm:$0xff] %vm305_vm3, %v1915_v47 }
 0x18a   : > { %2566 = vst.msk [vmem:[%s4068_s11 + $0x2c] sm:$0xf] %vm2554_vm4, %v3000_v10  ;;  %v2184_v14 = vadd.f32 %v4040_v2, %v2113_v11  ;;  %v2114_v16 = vmul.f32 %v4030_v43, %v2043_v18  ;;  %2564 = vst.msk [vmem:[%s4068_s11 + $0x24] sm:$0xf] %vm2554_vm4, %v2998_v56  ;;  %v1456_v27 = vpop.f32.mrb[52].mxu0  ;;  %v3126_v34 = vpop.f32.mrb[52].mxu1 }
 0x18b   : > { %v2041_v48 = vld [vmem:[#allocation2 + $0x68] sm:$0xff]  ;;  %v2182_v22 = vadd.f32 %v4040_v2, %v2111_v32  ;;  %1978 = vst.msk [vmem:[#allocation2 + $0x88] sm:$0xff] %vm305_vm3, %v1913_v19  ;;  %v1730_v38 = vadd.f32 %v3126_v34, %v4088_v31  ;;  %v1458_v39 = vpop.f32.mrb[53].mxu0  ;;  %v1721_v0 = vpop.f32.mrb[53].mxu1 }
 0x18c   : > { %v2112_v23 = vmul.f32 %v4030_v43, %v2041_v48  ;;  %v2248_v35 = vmax.f32 %v2184_v14, 0.0  ;;  %v2185_v8 = vadd.f32 %v4040_v2, %v2114_v16  ;;  %v1722_v54 = vadd.f32 %v1721_v0, %v4057_v26  ;;  %v1459_v58 = vpop.f32.mrb[54].mxu0  ;;  %v3127_v59 = vpop.f32.mrb[54].mxu1  ;;  %v391_v31 = vld [vmem:[#allocation2 + $0xa8] sm:$0xff]  ;;  %v396_v48 = vld [vmem:[#allocation2 + $0xd0] sm:$0xff] }
 0x18d   : > { %v2246_v50 = vmax.f32 %v2182_v22, 0.0  ;;  %v1918_v52 = vadd.f32 %v1730_v38, %v392_v30  ;;  %v1733_v12 = vadd.f32 %v3127_v59, %v4094_v55  ;;  %v1461_v60 = vpop.f32.mrb[55].mxu0  ;;  %v1724_v6 = vpop.f32.mrb[55].mxu1 }
 0x18e   : > { %v2183_v51 = vadd.f32 %v4040_v2, %v2112_v23  ;;  %v3003_v63 = vpack.c.bf16 %v2248_v35, %v2248_v35  ;;  %v2249_v3 = vmax.f32 %v2185_v8, 0.0  ;;  %v2046_v28 = vld [vmem:[#allocation2 + $0x90] sm:$0xff]  ;;  %v1916_v40 = vadd.f32 %v1722_v54, %v390_v42  ;;  %v394_v8 = vld [vmem:[#allocation2 + $0xc0] sm:$0xff] }
 0x18f   : > { %v3001_v7 = vpack.c.bf16 %v2246_v50, %v2246_v50  ;;  %v1725_v26 = vadd.f32 %v1724_v6, %v4063_v46  ;;  %v2117_v62 = vmul.f32 %v4030_v43, %v2046_v28  ;;  %1983 = vst.msk [vmem:[#allocation2 + $0xb0] sm:$0xff] %vm305_vm3, %v1918_v52  ;;  %v1919_v55 = vadd.f32 %v1733_v12, %v393_v36  ;;  %v395_v12 = vld [vmem:[#allocation2 + $0xc8] sm:$0xff] }
 0x190   : > { %v2247_v24 = vmax.f32 %v2183_v51, 0.0  ;;  %2569 = vst.msk [vmem:[%s4068_s11 + $0x38] sm:$0xf] %vm2554_vm4, %v3003_v63  ;;  %v3004_v44 = vpack.c.bf16 %v2249_v3, %v2249_v3  ;;  %v2044_v10 = vld [vmem:[#allocation2 + $0x80] sm:$0xff]  ;;  %v2047_v47 = vld [vmem:[#allocation2 + $0x98] sm:$0xff] }
 0x191   : > { %2567 = vst.msk [vmem:[%s4068_s11 + $0x30] sm:$0xf] %vm2554_vm4, %v3001_v7  ;;  %v2115_v15 = vmul.f32 %v4030_v43, %v2044_v10  ;;  %v1917_v56 = vadd.f32 %v1725_v26, %v391_v31  ;;  %v2188_v46 = vadd.f32 %v4040_v2, %v2117_v62  ;;  %v2118_v32 = vmul.f32 %v4030_v43, %v2047_v47  ;;  %v397_v51 = vld [vmem:[#allocation2 + $0xd8] sm:$0xff] }
 0x192   : > { %v3002_v11 = vpack.c.bf16 %v2247_v24, %v2247_v24  ;;  %1981 = vst.msk [vmem:[#allocation2 + $0xa0] sm:$0xff] %vm305_vm3, %v1916_v40  ;;  %v2045_v18 = vld [vmem:[#allocation2 + $0x88] sm:$0xff]  ;;  %1984 = vst.msk [vmem:[#allocation2 + $0xb8] sm:$0xff] %vm305_vm3, %v1919_v55  ;;  %v1464_v16 = vpop.f32.mrb[56].mxu0  ;;  %v3130_v22 = vpop.f32.mrb[56].mxu1 }
 0x193   : > { %2570 = vst.msk [vmem:[%s4068_s11 + $0x3c] sm:$0xf] %vm2554_vm4, %v3004_v44  ;;  %v2186_v19 = vadd.f32 %v4040_v2, %v2115_v15  ;;  %v2116_v14 = vmul.f32 %v4030_v43, %v2045_v18  ;;  %v2252_v23 = vmax.f32 %v2188_v46, 0.0  ;;  %v2189_v30 = vadd.f32 %v4040_v2, %v2118_v32  ;;  %v1466_v35 = vpop.f32.mrb[57].mxu0  ;;  %v1737_v38 = vpop.f32.mrb[57].mxu1  ;;  %v400_v46 = vld [vmem:[#allocation2 + $0xf0] sm:$0xff] }
 0x194   : > { %2568 = vst.msk [vmem:[%s4068_s11 + $0x34] sm:$0xf] %vm2554_vm4, %v3002_v11  ;;  %v1746_v34 = vadd.f32 %v3130_v22, %v1456_v27  ;;  %v1738_v0 = vadd.f32 %v1737_v38, %v4116_v4  ;;  %v1467_v50 = vpop.f32.mrb[58].mxu0  ;;  %v3131_v54 = vpop.f32.mrb[58].mxu1  ;;  %v398_v22 = vld [vmem:[#allocation2 + $0xe0] sm:$0xff]  ;;  %v401_v38 = vld [vmem:[#allocation2 + $0xf8] sm:$0xff] }
 0x195   : > { %1982 = vst.msk [vmem:[#allocation2 + $0xa8] sm:$0xff] %vm305_vm3, %v1917_v56  ;;  %v2250_v39 = vmax.f32 %v2186_v19, 0.0  ;;  %v2187_v42 = vadd.f32 %v4040_v2, %v2116_v14  ;;  %v3007_v36 = vpack.c.bf16 %v2252_v23, %v2252_v23  ;;  %v2253_v59 = vmax.f32 %v2189_v30, 0.0  ;;  %v1469_v52 = vpop.f32.mrb[59].mxu0  ;;  %v1740_v27 = vpop.f32.mrb[59].mxu1 }
 0x196   : > { %v1922_v63 = vadd.f32 %v1746_v34, %v396_v48  ;;  %v1749_v3 = vadd.f32 %v3131_v54, %v1459_v58  ;;  %v2050_v6 = vld [vmem:[#allocation2 + $0xb0] sm:$0xff]  ;;  %v1920_v7 = vadd.f32 %v1738_v0, %v394_v8  ;;  %v1741_v24 = vadd.f32 %v1740_v27, %v4122_v20 }
 0x197   : > { %v3005_v60 = vpack.c.bf16 %v2250_v39, %v2250_v39  ;;  %v2251_v31 = vmax.f32 %v2187_v42, 0.0  ;;  %2573 = vst.msk [vmem:[%s4068_s11 + $0x48] sm:$0xf] %vm2554_vm4, %v3007_v36  ;;  %v3008_v4 = vpack.c.bf16 %v2253_v59, %v2253_v59  ;;  %v2121_v28 = vmul.f32 %v4030_v43, %v2050_v6  ;;  %v399_v59 = vld [vmem:[#allocation2 + $0xe8] sm:$0xff] }
 0x198   : > { %1987 = vst.msk [vmem:[#allocation2 + $0xd0] sm:$0xff] %vm305_vm3, %v1922_v63  ;;  %v1923_v58 = vadd.f32 %v1749_v3, %v397_v51  ;;  %1985 = vst.msk [vmem:[#allocation2 + $0xc0] sm:$0xff] %vm305_vm3, %v1920_v7  ;;  %v1921_v10 = vadd.f32 %v1741_v24, %v395_v12 }
 0x199   : > { %v2048_v40 = vld [vmem:[#allocation2 + $0xa0] sm:$0xff]  ;;  %2571 = vst.msk [vmem:[%s4068_s11 + $0x40] sm:$0xf] %vm2554_vm4, %v3005_v60  ;;  %v3006_v26 = vpack.c.bf16 %v2251_v31, %v2251_v31  ;;  %v2051_v62 = vld [vmem:[#allocation2 + $0xb8] sm:$0xff]  ;;  %2574 = vst.msk [vmem:[%s4068_s11 + $0x4c] sm:$0xf] %vm2554_vm4, %v3008_v4  ;;  %v2192_v20 = vadd.f32 %v4040_v2, %v2121_v28 }
 0x19a   : > { %v2119_v44 = vmul.f32 %v4030_v43, %v2048_v40  ;;  %v2122_v55 = vmul.f32 %v4030_v43, %v2051_v62  ;;  %1988 = vst.msk [vmem:[#allocation2 + $0xd8] sm:$0xff] %vm305_vm3, %v1923_v58  ;;  %1986 = vst.msk [vmem:[#allocation2 + $0xc8] sm:$0xff] %vm305_vm3, %v1921_v10  ;;  %v1472_v56 = vpop.f32.mrb[60].mxu0  ;;  %v3134_v32 = vpop.f32.mrb[60].mxu1 }
 0x19b   : > { %2572 = vst.msk [vmem:[%s4068_s11 + $0x44] sm:$0xf] %vm2554_vm4, %v3006_v26  ;;  %v2256_v18 = vmax.f32 %v2192_v20, 0.0  ;;  %v1762_v14 = vadd.f32 %v3134_v32, %v1472_v56  ;;  %v1474_v48 = vpop.f32.mrb[61].mxu0  ;;  %v1753_v23 = vpop.f32.mrb[61].mxu1 }
 0x19c   : > { %v2049_v11 = vld [vmem:[#allocation2 + $0xa8] sm:$0xff]  ;;  %v2190_v15 = vadd.f32 %v4040_v2, %v2119_v44  ;;  %v2193_v19 = vadd.f32 %v4040_v2, %v2122_v55  ;;  %v1754_v35 = vadd.f32 %v1753_v23, %v1464_v16  ;;  %v1475_v8 = vpop.f32.mrb[62].mxu0  ;;  %v3135_v39 = vpop.f32.mrb[62].mxu1 }
 0x19d   : > { %v2120_v47 = vmul.f32 %v4030_v43, %v2049_v11  ;;  %v3011_v42 = vpack.c.bf16 %v2256_v18, %v2256_v18  ;;  %v1926_v51 = vadd.f32 %v1762_v14, %v400_v46  ;;  %v1765_v54 = vadd.f32 %v3135_v39, %v1475_v8  ;;  %v1477_v36 = vpop.f32.mrb[63].mxu0  ;;  %v1756_v63 = vpop.f32.mrb[63].mxu1 }
 0x19e   : > { %v2254_v30 = vmax.f32 %v2190_v15, 0.0  ;;  %v2257_v0 = vmax.f32 %v2193_v19, 0.0  ;;  %v1924_v27 = vadd.f32 %v1754_v35, %v398_v22  ;;  %v1757_v60 = vadd.f32 %v1756_v63, %v1467_v50 }
 0x19f   : > { %v2191_v34 = vadd.f32 %v4040_v2, %v2120_v47  ;;  %v2054_v12 = vld [vmem:[#allocation2 + $0xd0] sm:$0xff]  ;;  %2577 = vst.msk [vmem:[%s4068_s11 + $0x58] sm:$0xf] %vm2554_vm4, %v3011_v42  ;;  %v2052_v6 = vld [vmem:[#allocation2 + $0xc0] sm:$0xff]  ;;  %v1927_v7 = vadd.f32 %v1765_v54, %v401_v38 }
 0x1a0   : > { %v3009_v3 = vpack.c.bf16 %v2254_v30, %v2254_v30  ;;  %v3012_v16 = vpack.c.bf16 %v2257_v0, %v2257_v0  ;;  %v2125_v31 = vmul.f32 %v4030_v43, %v2054_v12  ;;  %1991 = vst.msk [vmem:[#allocation2 + $0xf0] sm:$0xff] %vm305_vm3, %v1926_v51  ;;  %v2123_v4 = vmul.f32 %v4030_v43, %v2052_v6  ;;  %v402_v47 = vld [vmem:[#allocation2 + $0x100] sm:$0xff]  ;;  %v403_v30 = vld [vmem:[#allocation2 + $0x108] sm:$0xff] }
 0x1a1   : > { %v2255_v52 = vmax.f32 %v2191_v34, 0.0  ;;  %v2055_v28 = vld [vmem:[#allocation2 + $0xd8] sm:$0xff]  ;;  %1989 = vst.msk [vmem:[#allocation2 + $0xe0] sm:$0xff] %vm305_vm3, %v1924_v27  ;;  %v1925_v40 = vadd.f32 %v1757_v60, %v399_v59  ;;  %v2053_v26 = vld [vmem:[#allocation2 + $0xc8] sm:$0xff]  ;;  %1992 = vst.msk [vmem:[#allocation2 + $0xf8] sm:$0xff] %vm305_vm3, %v1927_v7 }
 0x1a2   : > { %2575 = vst.msk [vmem:[%s4068_s11 + $0x50] sm:$0xf] %vm2554_vm4, %v3009_v3  ;;  %2578 = vst.msk [vmem:[%s4068_s11 + $0x5c] sm:$0xf] %vm2554_vm4, %v3012_v16  ;;  %v2196_v50 = vadd.f32 %v4040_v2, %v2125_v31  ;;  %v2126_v58 = vmul.f32 %v4030_v43, %v2055_v28  ;;  %v2194_v44 = vadd.f32 %v4040_v2, %v2123_v4  ;;  %v1480_v10 = vpop.f32.mrb[64].mxu0  ;;  %v3138_v20 = vpop.f32.mrb[64].mxu1 }
 0x1a3   : > { %v3010_v24 = vpack.c.bf16 %v2255_v52, %v2255_v52  ;;  %v2124_v62 = vmul.f32 %v4030_v43, %v2053_v26  ;;  %1990 = vst.msk [vmem:[#allocation2 + $0xe8] sm:$0xff] %vm305_vm3, %v1925_v40  ;;  %v1482_v15 = vpop.f32.mrb[65].mxu0  ;;  %v1769_v56 = vpop.f32.mrb[65].mxu1  ;;  %v404_v31 = vld [vmem:[#allocation2 + $0x110] sm:$0xff] }
 0x1a4   : > { %v2260_v55 = vmax.f32 %v2196_v50, 0.0  ;;  %v2197_v11 = vadd.f32 %v4040_v2, %v2126_v58  ;;  %v2258_v46 = vmax.f32 %v2194_v44, 0.0  ;;  %v1770_v18 = vadd.f32 %v1769_v56, %v1480_v10  ;;  %v1483_v19 = vpop.f32.mrb[66].mxu0  ;;  %v3139_v14 = vpop.f32.mrb[66].mxu1  ;;  %v405_v44 = vld [vmem:[#allocation2 + $0x118] sm:$0xff] }
 0x1a5   : > { %2576 = vst.msk [vmem:[%s4068_s11 + $0x54] sm:$0xf] %vm2554_vm4, %v3010_v24  ;;  %v2195_v32 = vadd.f32 %v4040_v2, %v2124_v62  ;;  %v1485_v23 = vpop.f32.mrb[67].mxu0  ;;  %v1772_v34 = vpop.f32.mrb[67].mxu1 }
 0x1a6   : > { %v3015_v48 = vpack.c.bf16 %v2260_v55, %v2260_v55  ;;  %v2261_v22 = vmax.f32 %v2197_v11, 0.0  ;;  %v3013_v35 = vpack.c.bf16 %v2258_v46, %v2258_v46  ;;  %v1928_v39 = vadd.f32 %v1770_v18, %v402_v47 }
 0x1a7   : > { %v2259_v8 = vmax.f32 %v2195_v32, 0.0  ;;  %v2058_v38 = vld [vmem:[#allocation2 + $0xf0] sm:$0xff]  ;;  %v1773_v42 = vadd.f32 %v1772_v34, %v1483_v19 }
 0x1a8   : > { %2581 = vst.msk [vmem:[%s4068_s11 + $0x68] sm:$0xf] %vm2554_vm4, %v3015_v48  ;;  %v3016_v0 = vpack.c.bf16 %v2261_v22, %v2261_v22  ;;  %v2129_v51 = vmul.f32 %v4030_v43, %v2058_v38  ;;  %v2056_v54 = vld [vmem:[#allocation2 + $0xe0] sm:$0xff]  ;;  %2579 = vst.msk [vmem:[%s4068_s11 + $0x60] sm:$0xf] %vm2554_vm4, %v3013_v35  ;;  %v2059_v63 = vld [vmem:[#allocation2 + $0xf8] sm:$0xff] }
 0x1a9   : > { %v3014_v36 = vpack.c.bf16 %v2259_v8, %v2259_v8  ;;  %v2127_v59 = vmul.f32 %v4030_v43, %v2056_v54  ;;  %1993 = vst.msk [vmem:[#allocation2 + $0x100] sm:$0xff] %vm305_vm3, %v1928_v39  ;;  %v1929_v3 = vadd.f32 %v1773_v42, %v403_v30  ;;  %v2130_v12 = vmul.f32 %v4030_v43, %v2059_v63  ;;  %v406_v35 = vld [vmem:[#allocation2 + $0x120] sm:$0xff] }
 0x1aa   : > { %2582 = vst.msk [vmem:[%s4068_s11 + $0x6c] sm:$0xf] %vm2554_vm4, %v3016_v0  ;;  %v2200_v52 = vadd.f32 %v4040_v2, %v2129_v51  ;;  %v2057_v27 = vld [vmem:[#allocation2 + $0xe8] sm:$0xff]  ;;  %v1488_v6 = vpop.f32.mrb[68].mxu0  ;;  %v4228_v7 = vpop.f32.mrb[68].mxu1 }
 0x1ab   : > { %2580 = vst.msk [vmem:[%s4068_s11 + $0x64] sm:$0xf] %vm2554_vm4, %v3014_v36  ;;  %v2198_v60 = vadd.f32 %v4040_v2, %v2127_v59  ;;  %v2128_v16 = vmul.f32 %v4030_v43, %v2057_v27  ;;  %v2201_v4 = vadd.f32 %v4040_v2, %v2130_v12  ;;  %v1778_v28 = vadd.f32 %v3138_v20, %v1488_v6  ;;  %v1490_v40 = vpop.f32.mrb[69].mxu0  ;;  %v1785_v50 = vpop.f32.mrb[69].mxu1  ;;  %v407_v36 = vld [vmem:[#allocation2 + $0x128] sm:$0xff] }
 0x1ac   : > { %1994 = vst.msk [vmem:[#allocation2 + $0x108] sm:$0xff] %vm305_vm3, %v1929_v3  ;;  %v2264_v24 = vmax.f32 %v2200_v52, 0.0  ;;  %v1491_v62 = vpop.f32.mrb[70].mxu0  ;;  %v4232_v10 = vpop.f32.mrb[70].mxu1 }
 0x1ad   : > { %v2262_v58 = vmax.f32 %v2198_v60, 0.0  ;;  %v2199_v26 = vadd.f32 %v4040_v2, %v2128_v16  ;;  %v2265_v11 = vmax.f32 %v2201_v4, 0.0  ;;  %v1930_v15 = vadd.f32 %v1778_v28, %v404_v31  ;;  %v1493_v56 = vpop.f32.mrb[71].mxu0  ;;  %v1788_v46 = vpop.f32.mrb[71].mxu1 }
 0x1ae   : > { %v3019_v55 = vpack.c.bf16 %v2264_v24, %v2264_v24  ;;  %v1781_v47 = vadd.f32 %v3139_v14, %v1491_v62  ;;  %v409_v56 = vld [vmem:[#allocation2 + $0x138] sm:$0xff] }
 0x1af   : > { %v3017_v20 = vpack.c.bf16 %v2262_v58, %v2262_v58  ;;  %v2263_v32 = vmax.f32 %v2199_v26, 0.0  ;;  %v3020_v18 = vpack.c.bf16 %v2265_v11, %v2265_v11  ;;  %1995 = vst.msk [vmem:[#allocation2 + $0x110] sm:$0xff] %vm305_vm3, %v1930_v15  ;;  %v408_v58 = vld [vmem:[#allocation2 + $0x130] sm:$0xff] }
 0x1b0   : > { %2585 = vst.msk [vmem:[%s4068_s11 + $0x78] sm:$0xf] %vm2554_vm4, %v3019_v55  ;;  %v2060_v19 = vld [vmem:[#allocation2 + $0x100] sm:$0xff]  ;;  %v1931_v48 = vadd.f32 %v1781_v47, %v405_v44 }
 0x1b1   : > { %2583 = vst.msk [vmem:[%s4068_s11 + $0x70] sm:$0xf] %vm2554_vm4, %v3017_v20  ;;  %v3018_v22 = vpack.c.bf16 %v2263_v32, %v2263_v32  ;;  %v2131_v23 = vmul.f32 %v4030_v43, %v2060_v19  ;;  %2586 = vst.msk [vmem:[%s4068_s11 + $0x7c] sm:$0xf] %vm2554_vm4, %v3020_v18 }
 0x1b2   : > { %1996 = vst.msk [vmem:[#allocation2 + $0x118] sm:$0xff] %vm305_vm3, %v1931_v48  ;;  %v1496_v8 = vpop.f32.mrb[72].mxu0  ;;  %v4247_v38 = vpop.f32.mrb[72].mxu1 }
 0x1b3   : > { %v2061_v14 = vld [vmem:[#allocation2 + $0x108] sm:$0xff]  ;;  %2584 = vst.msk [vmem:[%s4068_s11 + $0x74] sm:$0xf] %vm2554_vm4, %v3018_v22  ;;  %v2202_v30 = vadd.f32 %v4040_v2, %v2131_v23  ;;  %v1786_v39 = vadd.f32 %v1785_v50, %v1496_v8  ;;  %v1498_v42 = vpop.f32.mrb[73].mxu0  ;;  %v1801_v0 = vpop.f32.mrb[73].mxu1 }
 0x1b4   : > { %v2132_v34 = vmul.f32 %v4030_v43, %v2061_v14  ;;  %v1499_v59 = vpop.f32.mrb[74].mxu0  ;;  %v4250_v63 = vpop.f32.mrb[74].mxu1 }
 0x1b5   : > { %v2266_v51 = vmax.f32 %v2202_v30, 0.0  ;;  %v1932_v3 = vadd.f32 %v1786_v39, %v406_v35  ;;  %v1789_v52 = vadd.f32 %v1788_v46, %v1499_v59  ;;  %v1501_v12 = vpop.f32.mrb[75].mxu0  ;;  %v4252_v27 = vpop.f32.mrb[75].mxu1 }
 0x1b6   : > { %v2203_v54 = vadd.f32 %v4040_v2, %v2132_v34  ;;  %v2062_v31 = vld [vmem:[#allocation2 + $0x110] sm:$0xff] }
 0x1b7   : > { %v3021_v60 = vpack.c.bf16 %v2266_v51, %v2266_v51  ;;  %v2133_v6 = vmul.f32 %v4030_v43, %v2062_v31  ;;  %1997 = vst.msk [vmem:[#allocation2 + $0x120] sm:$0xff] %vm305_vm3, %v1932_v3  ;;  %v1933_v24 = vadd.f32 %v1789_v52, %v407_v36  ;;  %v420_v51 = vld [vmem:[#allocation2 + $0x190] sm:$0xff] }
 0x1b8   : > { %v2267_v16 = vmax.f32 %v2203_v54, 0.0 }
 0x1b9   : > { %2587 = vst.msk [vmem:[%s4068_s11 + $0x80] sm:$0xf] %vm2554_vm4, %v3021_v60  ;;  %v2063_v28 = vld [vmem:[#allocation2 + $0x118] sm:$0xff]  ;;  %v2204_v40 = vadd.f32 %v4040_v2, %v2133_v6  ;;  %v418_v60 = vld [vmem:[#allocation2 + $0x180] sm:$0xff] }
 0x1ba   : > { %v3022_v4 = vpack.c.bf16 %v2267_v16, %v2267_v16  ;;  %v2134_v50 = vmul.f32 %v4030_v43, %v2063_v28  ;;  %1998 = vst.msk [vmem:[#allocation2 + $0x128] sm:$0xff] %vm305_vm3, %v1933_v24  ;;  %v1504_v26 = vpop.f32.mrb[76].mxu0  ;;  %v4263_v44 = vpop.f32.mrb[76].mxu1 }
 0x1bb   : > { %v2268_v62 = vmax.f32 %v2204_v40, 0.0  ;;  %v1794_v11 = vadd.f32 %v4228_v7, %v1504_v26  ;;  %v1506_v15 = vpop.f32.mrb[77].mxu0  ;;  %v4267_v47 = vpop.f32.mrb[77].mxu1  ;;  %v421_v26 = vld [vmem:[#allocation2 + $0x198] sm:$0xff] }
 0x1bc   : > { %2588 = vst.msk [vmem:[%s4068_s11 + $0x84] sm:$0xf] %vm2554_vm4, %v3022_v4  ;;  %v2205_v55 = vadd.f32 %v4040_v2, %v2134_v50  ;;  %v1507_v46 = vpop.f32.mrb[78].mxu0  ;;  %v4269_v20 = vpop.f32.mrb[78].mxu1 }
 0x1bd   : > { %v3023_v32 = vpack.c.bf16 %v2268_v62, %v2268_v62  ;;  %v1934_v19 = vadd.f32 %v1794_v11, %v408_v58  ;;  %v1797_v48 = vadd.f32 %v4232_v10, %v1507_v46  ;;  %v1509_v22 = vpop.f32.mrb[79].mxu0  ;;  %v4272_v23 = vpop.f32.mrb[79].mxu1  ;;  %v410_v10 = vld [vmem:[#allocation2 + $0x140] sm:$0xff]  ;;  %v411_v58 = vld [vmem:[#allocation2 + $0x148] sm:$0xff] }
 0x1be   : > { %v2269_v18 = vmax.f32 %v2205_v55, 0.0  ;;  %v2064_v14 = vld [vmem:[#allocation2 + $0x120] sm:$0xff]  ;;  %v419_v55 = vld [vmem:[#allocation2 + $0x188] sm:$0xff] }
 0x1bf   : > { %2589 = vst.msk [vmem:[%s4068_s11 + $0x88] sm:$0xf] %vm2554_vm4, %v3023_v32  ;;  %v2135_v30 = vmul.f32 %v4030_v43, %v2064_v14  ;;  %v1935_v34 = vadd.f32 %v1797_v48, %v409_v56 }
 0x1c0   : > { %v3024_v7 = vpack.c.bf16 %v2269_v18, %v2269_v18  ;;  %1999 = vst.msk [vmem:[#allocation2 + $0x130] sm:$0xff] %vm305_vm3, %v1934_v19 }
 0x1c1   : > { %v2065_v35 = vld [vmem:[#allocation2 + $0x128] sm:$0xff]  ;;  %v2206_v8 = vadd.f32 %v4040_v2, %v2135_v30  ;;  %2000 = vst.msk [vmem:[#allocation2 + $0x138] sm:$0xff] %vm305_vm3, %v1935_v34 }
 0x1c2   : > { %2590 = vst.msk [vmem:[%s4068_s11 + $0x8c] sm:$0xf] %vm2554_vm4, %v3024_v7  ;;  %v2136_v39 = vmul.f32 %v4030_v43, %v2065_v35  ;;  %v1512_v42 = vpop.f32.mrb[80].mxu0  ;;  %v3154_v54 = vpop.f32.mrb[80].mxu1  ;;  %v424_v7 = vld [vmem:[#allocation2 + $0x1b0] sm:$0xff] }
 0x1c3   : > { %v2270_v36 = vmax.f32 %v2206_v8, 0.0  ;;  %v1802_v3 = vadd.f32 %v1801_v0, %v1512_v42  ;;  %v1842_v52 = vadd.f32 %v3154_v54, %v3959_v5  ;;  %v1514_v12 = vpop.f32.mrb[81].mxu0  ;;  %v1833_v16 = vpop.f32.mrb[81].mxu1  ;;  %v422_v42 = vld [vmem:[#allocation2 + $0x1a0] sm:$0xff] }
 0x1c4   : > { %v2207_v59 = vadd.f32 %v4040_v2, %v2136_v39  ;;  %v1834_v31 = vadd.f32 %v1833_v16, %v3953_v61  ;;  %v1515_v6 = vpop.f32.mrb[82].mxu0  ;;  %v3155_v24 = vpop.f32.mrb[82].mxu1  ;;  %v425_v16 = vld [vmem:[#allocation2 + $0x1b8] sm:$0xff] }
 0x1c5   : > { %v3025_v4 = vpack.c.bf16 %v2270_v36, %v2270_v36  ;;  %v1936_v40 = vadd.f32 %v1802_v3, %v410_v10  ;;  %v1946_v50 = vadd.f32 %v1842_v52, %v420_v51  ;;  %v1517_v62 = vpop.f32.mrb[83].mxu0  ;;  %v1836_v11 = vpop.f32.mrb[83].mxu1  ;;  %v1805_v15 = vadd.f32 %v4252_v27, %v1515_v6  ;;  %v412_v27 = vld [vmem:[#allocation2 + $0x150] sm:$0xff] }
 0x1c6   : > { %v2271_v28 = vmax.f32 %v2207_v59, 0.0  ;;  %v1944_v5 = vadd.f32 %v1834_v31, %v418_v60  ;;  %v1845_v56 = vadd.f32 %v3155_v24, %v3963_v9  ;;  %v1837_v61 = vadd.f32 %v1836_v11, %v3957_v1  ;;  %v413_v60 = vld [vmem:[#allocation2 + $0x158] sm:$0xff]  ;;  %v4327_v11 = vld [vmem:[%s4509_s3] ss:$0 sm:$0xff] }
 0x1c7   : > { %v2066_v0 = vld [vmem:[#allocation2 + $0x130] sm:$0xff]  ;;  %2591 = vst.msk [vmem:[%s4068_s11 + $0x90] sm:$0xf] %vm2554_vm4, %v3025_v4  ;;  %v1937_v19 = vadd.f32 %v1805_v15, %v411_v58 }
 0x1c8   : > { %v3026_v46 = vpack.c.bf16 %v2271_v28, %v2271_v28  ;;  %v2137_v32 = vmul.f32 %v4030_v43, %v2066_v0  ;;  %2001 = vst.msk [vmem:[#allocation2 + $0x140] sm:$0xff] %vm305_vm3, %v1936_v40  ;;  %2011 = vst.msk [vmem:[#allocation2 + $0x190] sm:$0xff] %vm305_vm3, %v1946_v50  ;;  %v2067_v18 = vld [vmem:[#allocation2 + $0x138] sm:$0xff]  ;;  %v1947_v48 = vadd.f32 %v1845_v56, %v421_v26  ;;  %v4314_v50 = vld [vmem:[%s4508_s2] ss:$0 sm:$0xff] }
 0x1c9   : > { %2009 = vst.msk [vmem:[#allocation2 + $0x180] sm:$0xff] %vm305_vm3, %v1944_v5  ;;  %v1945_v22 = vadd.f32 %v1837_v61, %v419_v55  ;;  %v2138_v1 = vmul.f32 %v4030_v43, %v2067_v18  ;;  %2002 = vst.msk [vmem:[#allocation2 + $0x148] sm:$0xff] %vm305_vm3, %v1937_v19 }
 0x1ca   : > { %2592 = vst.msk [vmem:[%s4068_s11 + $0x94] sm:$0xf] %vm2554_vm4, %v3026_v46  ;;  %v2208_v9 = vadd.f32 %v4040_v2, %v2137_v32  ;;  %v1520_v14 = vpop.f32.mrb[84].mxu0  ;;  %v3158_v30 = vpop.f32.mrb[84].mxu1 }
 0x1cb   : > { %2012 = vst.msk [vmem:[#allocation2 + $0x198] sm:$0xff] %vm305_vm3, %v1947_v48  ;;  %2010 = vst.msk [vmem:[#allocation2 + $0x188] sm:$0xff] %vm305_vm3, %v1945_v22  ;;  %v2209_v35 = vadd.f32 %v4040_v2, %v2138_v1  ;;  %v1810_v8 = vadd.f32 %v4247_v38, %v1520_v14  ;;  %v1858_v39 = vadd.f32 %v3158_v30, %v3975_v21  ;;  %v1522_v10 = vpop.f32.mrb[85].mxu0  ;;  %v1849_v43 = vpop.f32.mrb[85].mxu1  ;;  %v423_v2 = vld [vmem:[#allocation2 + $0x1a8] sm:$0xff]  ;;  %v414_v48 = vld [vmem:[#allocation2 + $0x160] sm:$0xff] }
 0x1cc   : > { %v2272_v34 = vmax.f32 %v2208_v9, 0.0  ;;  %v1850_v51 = vadd.f32 %v1849_v43, %v3967_v13  ;;  %v1523_v54 = vpop.f32.mrb[86].mxu0  ;;  %v3159_v36 = vpop.f32.mrb[86].mxu1  ;;  %v428_v9 = vld [vmem:[#allocation2 + $0x1d0] sm:$0xff] }
 0x1cd   : > { %v2273_v3 = vmax.f32 %v2209_v35, 0.0  ;;  %v1938_v52 = vadd.f32 %v1810_v8, %v412_v27  ;;  %v1950_v12 = vadd.f32 %v1858_v39, %v424_v7  ;;  %v1525_v31 = vpop.f32.mrb[87].mxu0  ;;  %v1852_v6 = vpop.f32.mrb[87].mxu1  ;;  %v1813_v4 = vadd.f32 %v4250_v63, %v1523_v54 }
 0x1ce   : > { %v3027_v59 = vpack.c.bf16 %v2272_v34, %v2272_v34  ;;  %v1948_v21 = vadd.f32 %v1850_v51, %v422_v42  ;;  %v1861_v13 = vadd.f32 %v3159_v36, %v3979_v25  ;;  %v1853_v28 = vadd.f32 %v1852_v6, %v3971_v17 }
 0x1cf   : > { %v2068_v38 = vld [vmem:[#allocation2 + $0x140] sm:$0xff]  ;;  %v2078_v24 = vld [vmem:[#allocation2 + $0x190] sm:$0xff]  ;;  %v3028_v40 = vpack.c.bf16 %v2273_v3, %v2273_v3  ;;  %2003 = vst.msk [vmem:[#allocation2 + $0x150] sm:$0xff] %vm305_vm3, %v1938_v52  ;;  %2015 = vst.msk [vmem:[#allocation2 + $0x1b0] sm:$0xff] %vm305_vm3, %v1950_v12  ;;  %v1939_v17 = vadd.f32 %v1813_v4, %v413_v60 }
 0x1d0   : > { %2593 = vst.msk [vmem:[%s4068_s11 + $0x98] sm:$0xf] %vm2554_vm4, %v3027_v59  ;;  %v2139_v58 = vmul.f32 %v4314_v50, %v2068_v38  ;;  %v2149_v26 = vmul.f32 %v4314_v50, %v2078_v24  ;;  %v2076_v62 = vld [vmem:[#allocation2 + $0x180] sm:$0xff]  ;;  %v1951_v63 = vadd.f32 %v1861_v13, %v425_v16  ;;  %v1949_v55 = vadd.f32 %v1853_v28, %v423_v2  ;;  %v2069_v15 = vld [vmem:[#allocation2 + $0x148] sm:$0xff] }
 0x1d1   : > { %v2147_v25 = vmul.f32 %v4314_v50, %v2076_v62  ;;  %2013 = vst.msk [vmem:[#allocation2 + $0x1a0] sm:$0xff] %vm305_vm3, %v1948_v21  ;;  %v2140_v32 = vmul.f32 %v4314_v50, %v2069_v15  ;;  %2004 = vst.msk [vmem:[#allocation2 + $0x158] sm:$0xff] %vm305_vm3, %v1939_v17  ;;  %v415_v38 = vld [vmem:[#allocation2 + $0x168] sm:$0xff] }
 0x1d2   : > { %2594 = vst.msk [vmem:[%s4068_s11 + $0x9c] sm:$0xf] %vm2554_vm4, %v3028_v40  ;;  %v2210_v0 = vadd.f32 %v4327_v11, %v2139_v58  ;;  %v2220_v5 = vadd.f32 %v4327_v11, %v2149_v26  ;;  %v2079_v56 = vld [vmem:[#allocation2 + $0x198] sm:$0xff]  ;;  %v2077_v61 = vld [vmem:[#allocation2 + $0x188] sm:$0xff]  ;;  %v1528_v22 = vpop.f32.mrb[88].mxu0  ;;  %v3162_v1 = vpop.f32.mrb[88].mxu1 }
 0x1d3   : > { %v2218_v46 = vadd.f32 %v4327_v11, %v2147_v25  ;;  %v2150_v18 = vmul.f32 %v4314_v50, %v2079_v56  ;;  %v2148_v19 = vmul.f32 %v4314_v50, %v2077_v61  ;;  %2016 = vst.msk [vmem:[#allocation2 + $0x1b8] sm:$0xff] %vm305_vm3, %v1951_v63  ;;  %2014 = vst.msk [vmem:[#allocation2 + $0x1a8] sm:$0xff] %vm305_vm3, %v1949_v55  ;;  %v1530_v34 = vpop.f32.mrb[89].mxu0  ;;  %v1865_v35 = vpop.f32.mrb[89].mxu1 }
 0x1d4   : > { %v2274_v27 = vmax.f32 %v2210_v0, 0.0  ;;  %v2284_v14 = vmax.f32 %v2220_v5, 0.0  ;;  %v1818_v7 = vadd.f32 %v4267_v47, %v1528_v22  ;;  %v1874_v30 = vadd.f32 %v3162_v1, %v3991_v37  ;;  %v1531_v43 = vpop.f32.mrb[90].mxu0  ;;  %v3163_v51 = vpop.f32.mrb[90].mxu1  ;;  %v426_v47 = vld [vmem:[#allocation2 + $0x1c0] sm:$0xff] }
 0x1d5   : > { %v2282_v8 = vmax.f32 %v2218_v46, 0.0  ;;  %v2211_v39 = vadd.f32 %v4327_v11, %v2140_v32  ;;  %v2221_v10 = vadd.f32 %v4327_v11, %v2150_v18  ;;  %v2219_v42 = vadd.f32 %v4327_v11, %v2148_v19  ;;  %v1533_v52 = vpop.f32.mrb[91].mxu0  ;;  %v1868_v37 = vpop.f32.mrb[91].mxu1  ;;  %v429_v46 = vld [vmem:[#allocation2 + $0x1d8] sm:$0xff]  ;;  %v427_v32 = vld [vmem:[#allocation2 + $0x1c8] sm:$0xff] }
 0x1d6   : > { %v3029_v54 = vpack.c.bf16 %v2274_v27, %v2274_v27  ;;  %v3039_v36 = vpack.c.bf16 %v2284_v14, %v2284_v14  ;;  %v1940_v59 = vadd.f32 %v1818_v7, %v414_v48  ;;  %v1954_v3 = vadd.f32 %v1874_v30, %v428_v9  ;;  %v2070_v2 = vld [vmem:[#allocation2 + $0x150] sm:$0xff] }
 0x1d7   : > { %v3037_v12 = vpack.c.bf16 %v2282_v8, %v2282_v8  ;;  %v2275_v60 = vmax.f32 %v2211_v39, 0.0  ;;  %v2285_v16 = vmax.f32 %v2221_v10, 0.0  ;;  %v2283_v31 = vmax.f32 %v2219_v42, 0.0  ;;  %v2082_v6 = vld [vmem:[#allocation2 + $0x1b0] sm:$0xff] }
 0x1d8   : > { %2595 = vst.msk [vmem:[%s4068_s11 + $0xa0] sm:$0xf] %vm2554_vm4, %v3029_v54  ;;  %2605 = vst.msk [vmem:[%s4068_s11 + $0xc8] sm:$0xf] %vm2554_vm4, %v3039_v36  ;;  %v2141_v24 = vmul.f32 %v4314_v50, %v2070_v2  ;;  %v2153_v21 = vmul.f32 %v4314_v50, %v2082_v6  ;;  %v2080_v4 = vld [vmem:[#allocation2 + $0x1a0] sm:$0xff]  ;;  %v1866_v13 = vadd.f32 %v1865_v35, %v3983_v29  ;;  %v2071_v63 = vld [vmem:[#allocation2 + $0x158] sm:$0xff] }
 0x1d9   : > { %2005 = vst.msk [vmem:[#allocation2 + $0x160] sm:$0xff] %vm305_vm3, %v1940_v59  ;;  %2019 = vst.msk [vmem:[#allocation2 + $0x1d0] sm:$0xff] %vm305_vm3, %v1954_v3  ;;  %v1821_v28 = vadd.f32 %v4272_v23, %v1531_v43  ;;  %v3030_v40 = vpack.c.bf16 %v2275_v60, %v2275_v60  ;;  %v3040_v58 = vpack.c.bf16 %v2285_v16, %v2285_v16  ;;  %v430_v6 = vld [vmem:[#allocation2 + $0x1e0] sm:$0xff] }
 0x1da   : > { %2603 = vst.msk [vmem:[%s4068_s11 + $0xc0] sm:$0xf] %vm2554_vm4, %v3037_v12  ;;  %v3038_v26 = vpack.c.bf16 %v2283_v31, %v2283_v31  ;;  %v2151_v62 = vmul.f32 %v4314_v50, %v2080_v4  ;;  %v2212_v25 = vadd.f32 %v4327_v11, %v2141_v24  ;;  %v2224_v17 = vadd.f32 %v4327_v11, %v2153_v21  ;;  %v2083_v55 = vld [vmem:[#allocation2 + $0x1b8] sm:$0xff]  ;;  %v2081_v0 = vld [vmem:[#allocation2 + $0x1a8] sm:$0xff]  ;;  %v1536_v18 = vpop.f32.mrb[92].mxu0  ;;  %v3166_v19 = vpop.f32.mrb[92].mxu1 }
 0x1db   : > { %v1952_v5 = vadd.f32 %v1866_v13, %v426_v47  ;;  %v1941_v15 = vadd.f32 %v1821_v28, %v415_v38  ;;  %2596 = vst.msk [vmem:[%s4068_s11 + $0xa4] sm:$0xf] %vm2554_vm4, %v3030_v40  ;;  %2606 = vst.msk [vmem:[%s4068_s11 + $0xcc] sm:$0xf] %vm2554_vm4, %v3040_v58  ;;  %v2142_v23 = vmul.f32 %v4314_v50, %v2071_v63  ;;  %v1538_v27 = vpop.f32.mrb[93].mxu0  ;;  %v1881_v14 = vpop.f32.mrb[93].mxu1 }
 0x1dc   : > { %2604 = vst.msk [vmem:[%s4068_s11 + $0xc4] sm:$0xf] %vm2554_vm4, %v3038_v26  ;;  %v2222_v29 = vadd.f32 %v4327_v11, %v2151_v62  ;;  %v2154_v56 = vmul.f32 %v4314_v50, %v2083_v55  ;;  %v2152_v61 = vmul.f32 %v4314_v50, %v2081_v0  ;;  %v2276_v48 = vmax.f32 %v2212_v25, 0.0  ;;  %v1539_v8 = vpop.f32.mrb[94].mxu0  ;;  %v3167_v39 = vpop.f32.mrb[94].mxu1  ;;  %v432_v12 = vld [vmem:[#allocation2 + $0x1f0] sm:$0xff] }
 0x1dd   : > { %v2288_v22 = vmax.f32 %v2224_v17, 0.0  ;;  %2017 = vst.msk [vmem:[#allocation2 + $0x1c0] sm:$0xff] %vm305_vm3, %v1952_v5  ;;  %2006 = vst.msk [vmem:[#allocation2 + $0x168] sm:$0xff] %vm305_vm3, %v1941_v15  ;;  %v1877_v9 = vadd.f32 %v3163_v51, %v3995_v41  ;;  %v1869_v1 = vadd.f32 %v1868_v37, %v3987_v33  ;;  %v2213_v30 = vadd.f32 %v4327_v11, %v2142_v23  ;;  %v416_v41 = vld [vmem:[#allocation2 + $0x170] sm:$0xff]  ;;  %v1541_v51 = vpop.f32.mrb[95].mxu0  ;;  %v1884_v33 = vpop.f32.mrb[95].mxu1 }
 0x1de   : > { %v2286_v7 = vmax.f32 %v2222_v29, 0.0  ;;  %v2225_v34 = vadd.f32 %v4327_v11, %v2154_v56  ;;  %v2223_v35 = vadd.f32 %v4327_v11, %v2152_v61  ;;  %v3031_v10 = vpack.c.bf16 %v2276_v48, %v2276_v48  ;;  %v417_v26 = vld [vmem:[#allocation2 + $0x178] sm:$0xff]  ;;  %v431_v62 = vld [vmem:[#allocation2 + $0x1e8] sm:$0xff] }
 0x1df   : > { %v3043_v42 = vpack.c.bf16 %v2288_v22, %v2288_v22  ;;  %v1955_v43 = vadd.f32 %v1877_v9, %v429_v46  ;;  %v1953_v54 = vadd.f32 %v1869_v1, %v427_v32  ;;  %v2277_v59 = vmax.f32 %v2213_v30, 0.0 }
 0x1e0   : > { %v3041_v36 = vpack.c.bf16 %v2286_v7, %v2286_v7  ;;  %v2289_v3 = vmax.f32 %v2225_v34, 0.0  ;;  %v2287_v47 = vmax.f32 %v2223_v35, 0.0  ;;  %v2072_v52 = vld [vmem:[#allocation2 + $0x160] sm:$0xff]  ;;  %v2086_v37 = vld [vmem:[#allocation2 + $0x1d0] sm:$0xff]  ;;  %2597 = vst.msk [vmem:[%s4068_s11 + $0xa8] sm:$0xf] %vm2554_vm4, %v3031_v10  ;;  %v1826_v31 = vadd.f32 %v4263_v44, %v1536_v18 }
 0x1e1   : > { %2609 = vst.msk [vmem:[%s4068_s11 + $0xd8] sm:$0xf] %vm2554_vm4, %v3043_v42  ;;  %v2143_v60 = vmul.f32 %v4314_v50, %v2072_v52  ;;  %v2157_v16 = vmul.f32 %v4314_v50, %v2086_v37  ;;  %v1890_v2 = vadd.f32 %v3166_v19, %v4007_v53  ;;  %v3032_v38 = vpack.c.bf16 %v2277_v59, %v2277_v59  ;;  %v433_v44 = vld [vmem:[#allocation2 + $0x1f8] sm:$0xff] }
 0x1e2   : > { %2020 = vst.msk [vmem:[#allocation2 + $0x1d8] sm:$0xff] %vm305_vm3, %v1955_v43  ;;  %2018 = vst.msk [vmem:[#allocation2 + $0x1c8] sm:$0xff] %vm305_vm3, %v1953_v54  ;;  %v3044_v24 = vpack.c.bf16 %v2289_v3, %v2289_v3  ;;  %v3042_v21 = vpack.c.bf16 %v2287_v47, %v2287_v47  ;;  %v1882_v4 = vadd.f32 %v1881_v14, %v3999_v45 }
 0x1e3   : > { %2607 = vst.msk [vmem:[%s4068_s11 + $0xd0] sm:$0xf] %vm2554_vm4, %v3041_v36  ;;  %v2214_v13 = vadd.f32 %v4327_v11, %v2143_v60  ;;  %v2228_v28 = vadd.f32 %v4327_v11, %v2157_v16  ;;  %v1942_v40 = vadd.f32 %v1826_v31, %v416_v41  ;;  %v1958_v58 = vadd.f32 %v1890_v2, %v432_v12 }
 0x1e4   : > { %2598 = vst.msk [vmem:[%s4068_s11 + $0xac] sm:$0xf] %vm2554_vm4, %v3032_v38  ;;  %2610 = vst.msk [vmem:[%s4068_s11 + $0xdc] sm:$0xf] %vm2554_vm4, %v3044_v24  ;;  %v2084_v53 = vld [vmem:[#allocation2 + $0x1c0] sm:$0xff]  ;;  %v2073_v25 = vld [vmem:[#allocation2 + $0x168] sm:$0xff]  ;;  %v1956_v17 = vadd.f32 %v1882_v4, %v430_v6  ;;  %v1829_v45 = vadd.f32 %v4269_v20, %v1539_v8  ;;  %v1893_v63 = vadd.f32 %v3167_v39, %v4011_v57 }
 0x1e5   : > { %2608 = vst.msk [vmem:[%s4068_s11 + $0xd4] sm:$0xf] %vm2554_vm4, %v3042_v21  ;;  %v1885_v55 = vadd.f32 %v1884_v33, %v4003_v49  ;;  %v2278_v0 = vmax.f32 %v2214_v13, 0.0  ;;  %v2292_v5 = vmax.f32 %v2228_v28, 0.0  ;;  %v2155_v15 = vmul.f32 %v4314_v50, %v2084_v53 }
 0x1e6   : > { %v2144_v29 = vmul.f32 %v4314_v50, %v2073_v25  ;;  %2007 = vst.msk [vmem:[#allocation2 + $0x170] sm:$0xff] %vm305_vm3, %v1942_v40  ;;  %2023 = vst.msk [vmem:[#allocation2 + $0x1f0] sm:$0xff] %vm305_vm3, %v1958_v58  ;;  %v1943_v23 = vadd.f32 %v1829_v45, %v417_v26  ;;  %v1959_v20 = vadd.f32 %v1893_v63, %v433_v44 }
 0x1e7   : > { %2021 = vst.msk [vmem:[#allocation2 + $0x1e0] sm:$0xff] %vm305_vm3, %v1956_v17  ;;  %v1957_v56 = vadd.f32 %v1885_v55, %v431_v62  ;;  %v3033_v57 = vpack.c.bf16 %v2278_v0, %v2278_v0  ;;  %v3047_v61 = vpack.c.bf16 %v2292_v5, %v2292_v5  ;;  %v2226_v49 = vadd.f32 %v4327_v11, %v2155_v15 }
 0x1e8   : > { %v2215_v46 = vadd.f32 %v4327_v11, %v2144_v29  ;;  %2008 = vst.msk [vmem:[#allocation2 + $0x178] sm:$0xff] %vm305_vm3, %v1943_v23  ;;  %2024 = vst.msk [vmem:[#allocation2 + $0x1f8] sm:$0xff] %vm305_vm3, %v1959_v20 }
 0x1e9   : > { %v2087_v32 = vld [vmem:[#allocation2 + $0x1d8] sm:$0xff]  ;;  %v2085_v18 = vld [vmem:[#allocation2 + $0x1c8] sm:$0xff]  ;;  %2022 = vst.msk [vmem:[#allocation2 + $0x1e8] sm:$0xff] %vm305_vm3, %v1957_v56  ;;  %v2290_v19 = vmax.f32 %v2226_v49, 0.0 }
 0x1ea   : > { %2599 = vst.msk [vmem:[%s4068_s11 + $0xb0] sm:$0xf] %vm2554_vm4, %v3033_v57  ;;  %2613 = vst.msk [vmem:[%s4068_s11 + $0xe8] sm:$0xf] %vm2554_vm4, %v3047_v61  ;;  %v2279_v48 = vmax.f32 %v2215_v46, 0.0  ;;  %v2158_v22 = vmul.f32 %v4314_v50, %v2087_v32  ;;  %v2156_v9 = vmul.f32 %v4314_v50, %v2085_v18 }
 0x1eb   : > { %v3045_v1 = vpack.c.bf16 %v2290_v19, %v2290_v19 }
 0x1ec   : > { %v3034_v27 = vpack.c.bf16 %v2279_v48, %v2279_v48  ;;  %v2229_v14 = vadd.f32 %v4327_v11, %v2158_v22  ;;  %v2227_v7 = vadd.f32 %v4327_v11, %v2156_v9 }
 0x1ed   : > { %v2074_v30 = vld [vmem:[#allocation2 + $0x170] sm:$0xff]  ;;  %2611 = vst.msk [vmem:[%s4068_s11 + $0xe0] sm:$0xf] %vm2554_vm4, %v3045_v1 }
 0x1ee   : > { %v2090_v34 = vld [vmem:[#allocation2 + $0x1f0] sm:$0xff]  ;;  %2600 = vst.msk [vmem:[%s4068_s11 + $0xb4] sm:$0xf] %vm2554_vm4, %v3034_v27  ;;  %v2293_v35 = vmax.f32 %v2229_v14, 0.0  ;;  %v2291_v8 = vmax.f32 %v2227_v7, 0.0  ;;  %v2145_v39 = vmul.f32 %v4314_v50, %v2074_v30  ;;  %v2088_v42 = vld [vmem:[#allocation2 + $0x1e0] sm:$0xff] }
 0x1ef   : > { %v2161_v10 = vmul.f32 %v4314_v50, %v2090_v34  ;;  %v2159_v43 = vmul.f32 %v4314_v50, %v2088_v42  ;;  %v2075_v36 = vld [vmem:[#allocation2 + $0x178] sm:$0xff] }
 0x1f0   : > { %v3048_v54 = vpack.c.bf16 %v2293_v35, %v2293_v35  ;;  %v3046_v41 = vpack.c.bf16 %v2291_v8, %v2291_v8  ;;  %v2216_v51 = vadd.f32 %v4327_v11, %v2145_v39  ;;  %v2091_v59 = vld [vmem:[#allocation2 + $0x1f8] sm:$0xff]  ;;  %v2089_v3 = vld [vmem:[#allocation2 + $0x1e8] sm:$0xff]  ;;  %v2146_v52 = vmul.f32 %v4314_v50, %v2075_v36 }
 0x1f1   : > { %v2232_v33 = vadd.f32 %v4327_v11, %v2161_v10  ;;  %v2230_v47 = vadd.f32 %v4327_v11, %v2159_v43  ;;  %v2162_v37 = vmul.f32 %v4314_v50, %v2091_v59  ;;  %v2160_v12 = vmul.f32 %v4314_v50, %v2089_v3 }
 0x1f2   : > { %2614 = vst.msk [vmem:[%s4068_s11 + $0xec] sm:$0xf] %vm2554_vm4, %v3048_v54  ;;  %2612 = vst.msk [vmem:[%s4068_s11 + $0xe4] sm:$0xf] %vm2554_vm4, %v3046_v41  ;;  %v2280_v60 = vmax.f32 %v2216_v51, 0.0  ;;  %v2217_v2 = vadd.f32 %v4327_v11, %v2146_v52 }
 0x1f3   : > { %v2296_v16 = vmax.f32 %v2232_v33, 0.0  ;;  %v2294_v31 = vmax.f32 %v2230_v47, 0.0  ;;  %v2233_v6 = vadd.f32 %v4327_v11, %v2162_v37  ;;  %v2231_v38 = vadd.f32 %v4327_v11, %v2160_v12 }
 0x1f4   : > { %v3035_v50 = vpack.c.bf16 %v2280_v60, %v2280_v60  ;;  %v2281_v4 = vmax.f32 %v2217_v2, 0.0 }
 0x1f5   : > { %v3051_v24 = vpack.c.bf16 %v2296_v16, %v2296_v16  ;;  %v3049_v21 = vpack.c.bf16 %v2294_v31, %v2294_v31  ;;  %v2297_v13 = vmax.f32 %v2233_v6, 0.0  ;;  %v2295_v28 = vmax.f32 %v2231_v38, 0.0 }
 0x1f6   : > { %2601 = vst.msk [vmem:[%s4068_s11 + $0xb8] sm:$0xf] %vm2554_vm4, %v3035_v50  ;;  %v3036_v11 = vpack.c.bf16 %v2281_v4, %v2281_v4 }
 0x1f7   : > { %2617 = vst.msk [vmem:[%s4068_s11 + $0xf8] sm:$0xf] %vm2554_vm4, %v3051_v24  ;;  %2615 = vst.msk [vmem:[%s4068_s11 + $0xf0] sm:$0xf] %vm2554_vm4, %v3049_v21  ;;  %v3052_v40 = vpack.c.bf16 %v2297_v13, %v2297_v13  ;;  %v3050_v58 = vpack.c.bf16 %v2295_v28, %v2295_v28 }
 0x1f8   : > { %2602 = vst.msk [vmem:[%s4068_s11 + $0xbc] sm:$0xf] %vm2554_vm4, %v3036_v11 }
 0x1f9   : > { %2618 = vst.msk [vmem:[%s4068_s11 + $0xfc] sm:$0xf] %vm2554_vm4, %v3052_v40  ;;  %2616 = vst.msk [vmem:[%s4068_s11 + $0xf4] sm:$0xf] %vm2554_vm4, %v3050_v58 }
 0x1fa   : > { %3426 = shalt.err (!%p3423_p5)
}
 0x1fb   : > { %s3427_s7 = scalar_lea.hbm %s4446_s18, 4096  ;;  %s3431_s12 = scalar_lea.hbm %s4510_s4, 8192 }
 0x1fc   : > { %p3428_p6 = scmp.ne.s32.totalorder %s4446_s18, %s3427_s7  ;;  %p3432_p10 = scmp.lt.u32.totalorder %s4446_s18, %s4510_s4 }
 0x1fd   : > { %p3433_p11 = scmp.lt.u32.totalorder %s3431_s12, %s3427_s7  ;;  %p3435_p13 = scmp.lt.u32.totalorder %s3427_s7, %s4446_s18 }
 0x1fe   : > { %p3429_p7 = pnand %p3428_p6, %p3564_p4 }
 0x1ff   : > { %p3434_p12 = por %p3433_p11, %p3432_p10 }
 0x200   : > { %p3430_p9 = pneg %p3429_p7 }
 0x201   : > { %p3436_p0 = por %p3435_p13, %p3434_p12 }
 0x203   : > { %p3437_p1 = pnand %p3436_p0, %p3430_p9 }
 0x205   : > { %3440 = shalt.err (!%p3437_p1)
}
 0x206   : > { %s3497_s21 = smov 64   ;;  %s3498_s22 = smov 4  }
 0x207   : > { %3201 = dma.vmem_to_hbm [thread:$0]  (%p3564_p4), %s4448_s26, 4096, %s4446_s18, %s4460_s5, %s3497_s21, %s3497_s21, %s3498_s22  }
 0x208 PF: > { %p3207_p2 = scmp.ge.s32.totalorder %s3491_s20, 2  ;;  %s2649_s29 = sand.u32 1, %s3471_s15  }
 0x209   : > { %s2650_s30 = scalar_lea.sflag [#allocation4], %s2649_s29 }
 0x20a   : > { %p3204_p3 = pnand %p3207_p2, %p3571_p8 }
 0x20c   : > { %3466 = dma.done.wait (!%p3204_p3), %s2650_s30, 4096  }
 0x20d   : > { %3468 = vsyncadd (!%p3204_p3), %s2650_s30, 4294963200  ;;  %s17_s20 = sadd.s32 1, %s3491_s20   ;;  %s4513_s15 = smov %s3475_s16 }
 0x20e   : > { %p14_p5 = scmp.ge.s32.totalorder %s17_s20, 4   ;;  %s4514_s16 = smov %s3479_s17 }
 0x20f   : > { %s4515_s17 = smov %s3577_s28  ;;  %s4516_s18 = smov %s3487_s19 }
 0x210   : > { %s4517_s19 = smov %s4519_s23  ;;  %16 = sbr.rel (!%p14_p5) target bundleno = 4 (0x4), region = 88 }
 0x217   :  { %2655 = vsyncpa [#allocation4], 1 }
 0x218   :  { %2657 = vsyncpa [#allocation4 + $0x1], 1 }

</bundles_post_ra>
